<compile_context>
chip_gen: v7x
topology: tpu7x:2x2x1
jax: 0.10.0
libtpu: 0.0.40
codegen_flags: <defaults>
</compile_context>

<pallas_src>
import math

import jax
import jax.numpy as jnp
from jax.experimental import pallas as pl
from jax.experimental.pallas import tpu as pltpu

# ---- small, self-consistent config (mirrors Config's structure) -------------
VOCAB = 256         # vocab_size (small synthetic stand-in for 50257)
BLOCK_SIZE = 16     # block_size
N_LAYER = 2         # n_layer
N_HEAD = 4          # n_head
N_EMBD = 32         # n_embd
HEAD_DIM = N_EMBD // N_HEAD
LN_EPS = 1e-5


# ----------------------------- in-kernel helpers -----------------------------
def _layernorm(x, g, b):
    mu = jnp.mean(x, axis=-1, keepdims=True)
    var = jnp.mean((x - mu) ** 2, axis=-1, keepdims=True)
    return (x - mu) * jax.lax.rsqrt(var + LN_EPS) * g + b


def _gelu_tanh(x):
    # tanh-approximate GELU: tanh runs on the EUP slot instead of a long VALU
    # polynomial. Error vs. exact erf GELU is negligible at |x| << 1.
    c = math.sqrt(2.0 / math.pi)
    return 0.5 * x * (1.0 + jnp.tanh(c * (x + 0.044715 * x * x * x)))


# ------------------------------- fused kernel --------------------------------
def fused_gpt_kernel(idx_ref, tok_ref, pos_ref,
                     ln1g_ref, ln1b_ref,
                     wq_ref, bq_ref, wk_ref, bk_ref, wv_ref, bv_ref,
                     wp_ref, bp_ref,
                     ln2g_ref, ln2b_ref,
                     w1_ref, b1_ref, w2_ref, b2_ref,
                     lnfg_ref, lnfb_ref, whead_ref,
                     out_ref):
    T = idx_ref.shape[0]
    V, C = tok_ref.shape
    H, D = N_HEAD, HEAD_DIM
    f32, bf16 = jnp.float32, jnp.bfloat16
    NEG = jnp.float32(-1e30)

    # ---- embedding gather via one-hot matmul (exact in f32) + position add --
    ids = idx_ref[...]                                            # (T, 1) int32
    vocab_iota = jax.lax.broadcasted_iota(jnp.int32, (T, V), 1)
    onehot = (vocab_iota == ids).astype(f32)                      # (T, V)
    x = jnp.dot(onehot, tok_ref[...], preferred_element_type=f32) + pos_ref[...]

    # causal mask, built once and reused by every layer
    row = jax.lax.broadcasted_iota(jnp.int32, (T, T), 0)
    col = jax.lax.broadcasted_iota(jnp.int32, (T, T), 1)
    causal = (row >= col)[None, :, :]                             # (1, T, T)
    scale = 1.0 / math.sqrt(D)

    for l in range(N_LAYER):                                      # static unroll
        # ---- attention sub-block: x = x + proj(MHA(ln1(x))) ----
        h1 = _layernorm(x, ln1g_ref[l], ln1b_ref[l])              # (T, C) f32
        h1b = jnp.broadcast_to(h1.astype(bf16), (H, T, C))        # head-batched
        q = jnp.einsum('htc,hcd->htd', h1b, wq_ref[l],
                       preferred_element_type=f32) + bq_ref[l]    # (H, T, D)
        k = jnp.einsum('htc,hcd->htd', h1b, wk_ref[l],
                       preferred_element_type=f32) + bk_ref[l]
        v = jnp.einsum('htc,hcd->htd', h1b, wv_ref[l],
                       preferred_element_type=f32) + bv_ref[l]

        s = jnp.einsum('htd,hsd->hts', q.astype(bf16), k.astype(bf16),
                       preferred_element_type=f32) * scale        # (H, T, T)
        s = jnp.where(causal, s, NEG)
        s = s - jnp.max(s, axis=-1, keepdims=True)
        e = jnp.exp(s)
        p = e * pl.reciprocal(jnp.sum(e, axis=-1, keepdims=True), approx=True)
        # dropout(p=0.1) on attention weights is identity in eval mode
        o = jnp.einsum('hts,hsd->htd', p.astype(bf16), v.astype(bf16),
                       preferred_element_type=f32)                # (H, T, D)
        attn = jnp.einsum('htd,hdc->htc', o.astype(bf16), wp_ref[l],
                          preferred_element_type=f32)             # (H, T, C)
        x = x + jnp.sum(attn, axis=0) + bp_ref[l]

        # ---- feed-forward sub-block: x = x + W2 @ gelu(W1 @ ln2(x)) ----
        h2 = _layernorm(x, ln2g_ref[l], ln2b_ref[l])
        f = jnp.dot(h2.astype(bf16), w1_ref[l],
                    preferred_element_type=f32) + b1_ref[l]
        f = _gelu_tanh(f)
        f = jnp.dot(f.astype(bf16), w2_ref[l],
                    preferred_element_type=f32) + b2_ref[l]
        # dropout(p=0.1) after the MLP is identity in eval mode
        x = x + f

    # ---- final LayerNorm + LM head (lane-dense (T, 256) output) ----
    hF = _layernorm(x, lnfg_ref[...], lnfb_ref[...])
    out_ref[...] = jnp.dot(hF.astype(bf16), whead_ref[...],
                           preferred_element_type=f32)


# ----------------------------- pallas_call wrapper ----------------------------
def _resident_spec(a):
    """Full-array block, constant index map -> stays VMEM-resident across grid."""
    nd = a.ndim

    def idx_map(b):
        return (0,) * nd

    return pl.BlockSpec(a.shape, idx_map)


def pack_kernel_params(params):
    """Stack per-layer params along a leading layer axis, reshape QKV/proj
    weights to per-head layout, and cast matmul weights to bf16."""
    bf16 = jnp.bfloat16
    L, H, D, C = N_LAYER, N_HEAD, HEAD_DIM, N_EMBD

    def stack(name):
        return jnp.stack([lp[name] for lp in params['layers']], axis=0)

    def per_head_in(w):        # (L, C, C) -> (L, H, C, D)
        return w.reshape(L, C, H, D).transpose(0, 2, 1, 3)

    def per_head_bias(b):      # (L, 1, C) -> (L, H, 1, D)
        return b.reshape(L, 1, H, D).transpose(0, 2, 1, 3)

    return {
        'tok_emb': params['tok_emb'],                   # f32 -> exact gather
        'ln1_g': stack('ln1_g'), 'ln1_b': stack('ln1_b'),
        'wq': per_head_in(stack('wq')).astype(bf16), 'bq': per_head_bias(stack('bq')),
        'wk': per_head_in(stack('wk')).astype(bf16), 'bk': per_head_bias(stack('bk')),
        'wv': per_head_in(stack('wv')).astype(bf16), 'bv': per_head_bias(stack('bv')),
        'wp': stack('wp').reshape(L, H, D, C).astype(bf16), 'bp': stack('bp'),
        'ln2_g': stack('ln2_g'), 'ln2_b': stack('ln2_b'),
        'w1': stack('w1').astype(bf16), 'b1': stack('b1'),
        'w2': stack('w2').astype(bf16), 'b2': stack('b2'),
        'lnf_g': params['lnf_g'], 'lnf_b': params['lnf_b'],
        'w_head': params['w_head'].astype(bf16),
    }


def ironmind_forward(idx, params):
    """Pallas-kernel forward pass. idx: (B, T) int32 -> logits (B, T, VOCAB)."""
    B, T = idx.shape
    kp = pack_kernel_params(params)
    idx3 = idx.reshape(B, T, 1).astype(jnp.int32)
    pos = params['pos_emb'][:T]                         # (T, C)

    weight_args = [
        kp['tok_emb'], pos,
        kp['ln1_g'], kp['ln1_b'],
        kp['wq'], kp['bq'], kp['wk'], kp['bk'], kp['wv'], kp['bv'],
        kp['wp'], kp['bp'],
        kp['ln2_g'], kp['ln2_b'],
        kp['w1'], kp['b1'], kp['w2'], kp['b2'],
        kp['lnf_g'], kp['lnf_b'], kp['w_head'],
    ]
    in_specs = ([pl.BlockSpec((None, T, 1), lambda b: (b, 0, 0))]
                + [_resident_spec(a) for a in weight_args])

    return pl.pallas_call(
        fused_gpt_kernel,
        out_shape=jax.ShapeDtypeStruct((B, T, VOCAB), jnp.float32),
        grid=(B,),
        in_specs=in_specs,
        out_specs=pl.BlockSpec((None, T, VOCAB), lambda b: (b, 0, 0)),
        compiler_params=pltpu.CompilerParams(
            dimension_semantics=("parallel",)),
    )(idx3, *weight_args)


# ----------------------------- parameter init --------------------------------
def init_params(key):
    n_rand = 3 + 12 * N_LAYER                           # exact key count
    keys = iter(jax.random.split(key, n_rand))

    def nrm(shape, scale=0.02):
        return scale * jax.random.normal(next(keys), shape, jnp.float32)

    params = {
        'tok_emb': nrm((VOCAB, N_EMBD)),
        'pos_emb': nrm((BLOCK_SIZE, N_EMBD)),
        'layers': [],
        'lnf_g': jnp.ones((1, N_EMBD), jnp.float32),
        'lnf_b': jnp.zeros((1, N_EMBD), jnp.float32),
        'w_head': nrm((N_EMBD, VOCAB)),                 # head has no bias
    }
    for _ in range(N_LAYER):
        params['layers'].append({
            'ln1_g': jnp.ones((1, N_EMBD), jnp.float32),
            'ln1_b': jnp.zeros((1, N_EMBD), jnp.float32),
            'wq': nrm((N_EMBD, N_EMBD)), 'bq': nrm((1, N_EMBD)),
            'wk': nrm((N_EMBD, N_EMBD)), 'bk': nrm((1, N_EMBD)),
            'wv': nrm((N_EMBD, N_EMBD)), 'bv': nrm((1, N_EMBD)),
            'wp': nrm((N_EMBD, N_EMBD)), 'bp': nrm((1, N_EMBD)),
            'ln2_g': jnp.ones((1, N_EMBD), jnp.float32),
            'ln2_b': jnp.zeros((1, N_EMBD), jnp.float32),
            'w1': nrm((N_EMBD, 4 * N_EMBD)), 'b1': nrm((1, 4 * N_EMBD)),
            'w2': nrm((4 * N_EMBD, N_EMBD)), 'b2': nrm((1, N_EMBD)),
        })
    return params


# ----------------------------- pure-JAX reference -----------------------------
def ref_forward(idx, params):
    B, T = idx.shape
    x = params['tok_emb'][idx] + params['pos_emb'][:T][None]
    mask = jnp.tril(jnp.ones((T, T), bool))

    def ln(x, g, b):
        mu = x.mean(-1, keepdims=True)
        var = ((x - mu) ** 2).mean(-1, keepdims=True)
        return (x - mu) / jnp.sqrt(var + LN_EPS) * g + b

    for p in params['layers']:
        h = ln(x, p['ln1_g'], p['ln1_b'])
        q = (h @ p['wq'] + p['bq']).reshape(B, T, N_HEAD, HEAD_DIM).transpose(0, 2, 1, 3)
        k = (h @ p['wk'] + p['bk']).reshape(B, T, N_HEAD, HEAD_DIM).transpose(0, 2, 1, 3)
        v = (h @ p['wv'] + p['bv']).reshape(B, T, N_HEAD, HEAD_DIM).transpose(0, 2, 1, 3)
        s = (q @ k.transpose(0, 1, 3, 2)) / math.sqrt(HEAD_DIM)
        s = jnp.where(mask, s, -jnp.inf)
        w = jax.nn.softmax(s, axis=-1)
        o = (w @ v).transpose(0, 2, 1, 3).reshape(B, T, N_EMBD)
        x = x + o @ p['wp'] + p['bp']
        h2 = ln(x, p['ln2_g'], p['ln2_b'])
        f = jax.nn.gelu(h2 @ p['w1'] + p['b1'], approximate=False)
        x = x + f @ p['w2'] + p['b2']
    x = ln(x, params['lnf_g'], params['lnf_b'])
    return x @ params['w_head']


# ------------------------------------ main ------------------------------------
if __name__ == "__main__":
    key = jax.random.PRNGKey(0)
    pkey, ikey = jax.random.split(key)
    params = init_params(pkey)

    B, T = 2, 8
    idx = jax.random.randint(ikey, (B, T), 0, VOCAB, dtype=jnp.int32)

    logits = ironmind_forward(idx, params)
    logits = jax.block_until_ready(logits)
    assert logits.shape == (B, T, VOCAB)

    ref = ref_forward(idx, params)
    max_err = float(jnp.max(jnp.abs(logits - ref)))
    # bf16 MXU operands / approx reciprocal / tanh-GELU stay well inside 5e-3
    assert jnp.allclose(logits, ref, atol=5e-3, rtol=5e-3), f"max_err={max_err}"

    print("KERNEL_OK")
</pallas_src>

<mosaic_0001>
module attributes {stable_mosaic.version = 11 : i64} {
  func.func @fused_gpt_kernel(%arg0: i32, %arg1: memref<1x8x1xi32, #tpu.memory_space<vmem>>, %arg2: memref<256x32xf32, #tpu.memory_space<vmem>>, %arg3: memref<8x32xf32, #tpu.memory_space<vmem>>, %arg4: memref<2x1x32xf32, #tpu.memory_space<vmem>>, %arg5: memref<2x1x32xf32, #tpu.memory_space<vmem>>, %arg6: memref<2x4x32x8xbf16, #tpu.memory_space<vmem>>, %arg7: memref<2x4x1x8xf32, #tpu.memory_space<vmem>>, %arg8: memref<2x4x32x8xbf16, #tpu.memory_space<vmem>>, %arg9: memref<2x4x1x8xf32, #tpu.memory_space<vmem>>, %arg10: memref<2x4x32x8xbf16, #tpu.memory_space<vmem>>, %arg11: memref<2x4x1x8xf32, #tpu.memory_space<vmem>>, %arg12: memref<2x4x8x32xbf16, #tpu.memory_space<vmem>>, %arg13: memref<2x1x32xf32, #tpu.memory_space<vmem>>, %arg14: memref<2x1x32xf32, #tpu.memory_space<vmem>>, %arg15: memref<2x1x32xf32, #tpu.memory_space<vmem>>, %arg16: memref<2x32x128xbf16, #tpu.memory_space<vmem>>, %arg17: memref<2x1x128xf32, #tpu.memory_space<vmem>>, %arg18: memref<2x128x32xbf16, #tpu.memory_space<vmem>>, %arg19: memref<2x1x32xf32, #tpu.memory_space<vmem>>, %arg20: memref<1x32xf32, #tpu.memory_space<vmem>>, %arg21: memref<1x32xf32, #tpu.memory_space<vmem>>, %arg22: memref<32x256xbf16, #tpu.memory_space<vmem>>, %arg23: memref<1x8x256xf32, #tpu.memory_space<vmem>>) attributes {dimension_semantics = [#tpu.dimension_semantics<parallel>], iteration_bounds = array<i64: 2>, scalar_prefetch = 0 : i64, scratch_operands = 0 : i64, tpu.core_type = #tpu.core_type<tc>, window_params = [{transform_indices = @transform_0, window_bounds = array<i64: 1, 8, 1>}, {pipeline_mode = #tpu.pipeline_mode<synchronous>, transform_indices = @transform_1, window_bounds = array<i64: 256, 32>}, {pipeline_mode = #tpu.pipeline_mode<synchronous>, transform_indices = @transform_2, window_bounds = array<i64: 8, 32>}, {pipeline_mode = #tpu.pipeline_mode<synchronous>, transform_indices = @transform_3, window_bounds = array<i64: 2, 1, 32>}, {pipeline_mode = #tpu.pipeline_mode<synchronous>, transform_indices = @transform_4, window_bounds = array<i64: 2, 1, 32>}, {pipeline_mode = #tpu.pipeline_mode<synchronous>, transform_indices = @transform_5, window_bounds = array<i64: 2, 4, 32, 8>}, {pipeline_mode = #tpu.pipeline_mode<synchronous>, transform_indices = @transform_6, window_bounds = array<i64: 2, 4, 1, 8>}, {pipeline_mode = #tpu.pipeline_mode<synchronous>, transform_indices = @transform_7, window_bounds = array<i64: 2, 4, 32, 8>}, {pipeline_mode = #tpu.pipeline_mode<synchronous>, transform_indices = @transform_8, window_bounds = array<i64: 2, 4, 1, 8>}, {pipeline_mode = #tpu.pipeline_mode<synchronous>, transform_indices = @transform_9, window_bounds = array<i64: 2, 4, 32, 8>}, {pipeline_mode = #tpu.pipeline_mode<synchronous>, transform_indices = @transform_10, window_bounds = array<i64: 2, 4, 1, 8>}, {pipeline_mode = #tpu.pipeline_mode<synchronous>, transform_indices = @transform_11, window_bounds = array<i64: 2, 4, 8, 32>}, {pipeline_mode = #tpu.pipeline_mode<synchronous>, transform_indices = @transform_12, window_bounds = array<i64: 2, 1, 32>}, {pipeline_mode = #tpu.pipeline_mode<synchronous>, transform_indices = @transform_13, window_bounds = array<i64: 2, 1, 32>}, {pipeline_mode = #tpu.pipeline_mode<synchronous>, transform_indices = @transform_14, window_bounds = array<i64: 2, 1, 32>}, {pipeline_mode = #tpu.pipeline_mode<synchronous>, transform_indices = @transform_15, window_bounds = array<i64: 2, 32, 128>}, {pipeline_mode = #tpu.pipeline_mode<synchronous>, transform_indices = @transform_16, window_bounds = array<i64: 2, 1, 128>}, {pipeline_mode = #tpu.pipeline_mode<synchronous>, transform_indices = @transform_17, window_bounds = array<i64: 2, 128, 32>}, {pipeline_mode = #tpu.pipeline_mode<synchronous>, transform_indices = @transform_18, window_bounds = array<i64: 2, 1, 32>}, {pipeline_mode = #tpu.pipeline_mode<synchronous>, transform_indices = @transform_19, window_bounds = array<i64: 1, 32>}, {pipeline_mode = #tpu.pipeline_mode<synchronous>, transform_indices = @transform_20, window_bounds = array<i64: 1, 32>}, {pipeline_mode = #tpu.pipeline_mode<synchronous>, transform_indices = @transform_21, window_bounds = array<i64: 32, 256>}, {transform_indices = @transform_22, window_bounds = array<i64: 1, 8, 256>}]} {
    %c0 = arith.constant 0 : index
    %c0_0 = arith.constant 0 : index
    %c0_1 = arith.constant 0 : index
    %0 = vector.load %arg1[%c0, %c0_0, %c0_1] : memref<1x8x1xi32, #tpu.memory_space<vmem>>, vector<1x8x1xi32>
    %1 = vector.shape_cast %0 : vector<1x8x1xi32> to vector<8x1xi32>
    %2 = tpu.iota {dimensions = array<i32: 1>} : vector<8x256xi32>
    %3 = vector.broadcast %1 : vector<8x1xi32> to vector<8x256xi32>
    %4 = arith.cmpi eq, %2, %3 : vector<8x256xi32>
    %5 = arith.extui %4 : vector<8x256xi1> to vector<8x256xi32>
    %6 = arith.sitofp %5 : vector<8x256xi32> to vector<8x256xf32>
    %c0_2 = arith.constant 0 : index
    %c0_3 = arith.constant 0 : index
    %7 = vector.load %arg2[%c0_2, %c0_3] : memref<256x32xf32, #tpu.memory_space<vmem>>, vector<256x32xf32>
    %cst = arith.constant dense<0.000000e+00> : vector<8x32xf32>
    %8 = tpu.matmul %6, %7, %cst {dimension_numbers = #tpu.dot_dimension_numbers<[1], [0], [0], [1], [0, 0, 1, 1], [], []>} : vector<8x256xf32>, vector<256x32xf32>, vector<8x32xf32> -> vector<8x32xf32>
    %c0_4 = arith.constant 0 : index
    %c0_5 = arith.constant 0 : index
    %9 = vector.load %arg3[%c0_4, %c0_5] : memref<8x32xf32, #tpu.memory_space<vmem>>, vector<8x32xf32>
    %10 = arith.addf %8, %9 : vector<8x32xf32>
    %11 = tpu.iota {dimensions = array<i32: 0>} : vector<8x8xi32>
    %12 = tpu.iota {dimensions = array<i32: 1>} : vector<8x8xi32>
    %13 = arith.cmpi sge, %11, %12 : vector<8x8xi32>
    %14 = vector.shape_cast %13 : vector<8x8xi1> to vector<1x8x8xi1>
    %c0_6 = arith.constant 0 : index
    %c0_7 = arith.constant 0 : index
    %c0_8 = arith.constant 0 : index
    %15 = vector.load %arg4[%c0_6, %c0_7, %c0_8] : memref<2x1x32xf32, #tpu.memory_space<vmem>>, vector<1x1x32xf32>
    %16 = vector.shape_cast %15 : vector<1x1x32xf32> to vector<1x32xf32>
    %c0_9 = arith.constant 0 : index
    %c0_10 = arith.constant 0 : index
    %c0_11 = arith.constant 0 : index
    %17 = vector.load %arg5[%c0_9, %c0_10, %c0_11] : memref<2x1x32xf32, #tpu.memory_space<vmem>>, vector<1x1x32xf32>
    %18 = vector.shape_cast %17 : vector<1x1x32xf32> to vector<1x32xf32>
    %cst_12 = arith.constant dense<0.000000e+00> : vector<8xf32>
    %19 = vector.multi_reduction <add>, %10, %cst_12 [1] : vector<8x32xf32> to vector<8xf32>
    %20 = vector.shape_cast %19 : vector<8xf32> to vector<8x1xf32>
    %cst_13 = arith.constant 3.200000e+01 : f32
    %21 = vector.broadcast %cst_13 : f32 to vector<8x1xf32>
    %22 = arith.divf %20, %21 : vector<8x1xf32>
    %23 = vector.broadcast %22 : vector<8x1xf32> to vector<8x32xf32>
    %24 = arith.subf %10, %23 : vector<8x32xf32>
    %25 = arith.mulf %24, %24 : vector<8x32xf32>
    %cst_14 = arith.constant dense<0.000000e+00> : vector<8xf32>
    %26 = vector.multi_reduction <add>, %25, %cst_14 [1] : vector<8x32xf32> to vector<8xf32>
    %27 = vector.shape_cast %26 : vector<8xf32> to vector<8x1xf32>
    %cst_15 = arith.constant 3.200000e+01 : f32
    %28 = vector.broadcast %cst_15 : f32 to vector<8x1xf32>
    %29 = arith.divf %27, %28 : vector<8x1xf32>
    %30 = vector.broadcast %22 : vector<8x1xf32> to vector<8x32xf32>
    %31 = arith.subf %10, %30 : vector<8x32xf32>
    %cst_16 = arith.constant 9.99999974E-6 : f32
    %32 = vector.broadcast %cst_16 : f32 to vector<8x1xf32>
    %33 = arith.addf %29, %32 : vector<8x1xf32>
    %34 = math.rsqrt %33 : vector<8x1xf32>
    %35 = vector.broadcast %34 : vector<8x1xf32> to vector<8x32xf32>
    %36 = arith.mulf %31, %35 : vector<8x32xf32>
    %37 = vector.broadcast %16 : vector<1x32xf32> to vector<8x32xf32>
    %38 = arith.mulf %36, %37 : vector<8x32xf32>
    %39 = vector.broadcast %18 : vector<1x32xf32> to vector<8x32xf32>
    %40 = arith.addf %38, %39 : vector<8x32xf32>
    %41 = arith.truncf %40 : vector<8x32xf32> to vector<8x32xbf16>
    %42 = vector.shape_cast %41 : vector<8x32xbf16> to vector<1x8x32xbf16>
    %43 = vector.broadcast %42 : vector<1x8x32xbf16> to vector<4x8x32xbf16>
    %c0_17 = arith.constant 0 : index
    %c0_18 = arith.constant 0 : index
    %c0_19 = arith.constant 0 : index
    %c0_20 = arith.constant 0 : index
    %44 = vector.load %arg6[%c0_17, %c0_18, %c0_19, %c0_20] : memref<2x4x32x8xbf16, #tpu.memory_space<vmem>>, vector<1x4x32x8xbf16>
    %45 = vector.shape_cast %44 : vector<1x4x32x8xbf16> to vector<4x32x8xbf16>
    "tpu.trace_start"() <{level = 10 : i32, message = "htc,hcd->htd"}> : () -> ()
    %cst_21 = arith.constant dense<0.000000e+00> : vector<4x8x8xf32>
    %46 = tpu.matmul %43, %45, %cst_21 {dimension_numbers = #tpu.dot_dimension_numbers<[2], [1], [1], [2], [0, 0, 0, 1, 1, 2], [0], [0]>} : vector<4x8x32xbf16>, vector<4x32x8xbf16>, vector<4x8x8xf32> -> vector<4x8x8xf32>
    "tpu.trace_stop"() : () -> ()
    %c0_22 = arith.constant 0 : index
    %c0_23 = arith.constant 0 : index
    %c0_24 = arith.constant 0 : index
    %c0_25 = arith.constant 0 : index
    %47 = vector.load %arg7[%c0_22, %c0_23, %c0_24, %c0_25] : memref<2x4x1x8xf32, #tpu.memory_space<vmem>>, vector<1x4x1x8xf32>
    %48 = vector.shape_cast %47 : vector<1x4x1x8xf32> to vector<4x1x8xf32>
    %49 = vector.broadcast %48 : vector<4x1x8xf32> to vector<4x8x8xf32>
    %50 = arith.addf %46, %49 : vector<4x8x8xf32>
    %c0_26 = arith.constant 0 : index
    %c0_27 = arith.constant 0 : index
    %c0_28 = arith.constant 0 : index
    %c0_29 = arith.constant 0 : index
    %51 = vector.load %arg8[%c0_26, %c0_27, %c0_28, %c0_29] : memref<2x4x32x8xbf16, #tpu.memory_space<vmem>>, vector<1x4x32x8xbf16>
    %52 = vector.shape_cast %51 : vector<1x4x32x8xbf16> to vector<4x32x8xbf16>
    "tpu.trace_start"() <{level = 10 : i32, message = "htc,hcd->htd"}> : () -> ()
    %cst_30 = arith.constant dense<0.000000e+00> : vector<4x8x8xf32>
    %53 = tpu.matmul %43, %52, %cst_30 {dimension_numbers = #tpu.dot_dimension_numbers<[2], [1], [1], [2], [0, 0, 0, 1, 1, 2], [0], [0]>} : vector<4x8x32xbf16>, vector<4x32x8xbf16>, vector<4x8x8xf32> -> vector<4x8x8xf32>
    "tpu.trace_stop"() : () -> ()
    %c0_31 = arith.constant 0 : index
    %c0_32 = arith.constant 0 : index
    %c0_33 = arith.constant 0 : index
    %c0_34 = arith.constant 0 : index
    %54 = vector.load %arg9[%c0_31, %c0_32, %c0_33, %c0_34] : memref<2x4x1x8xf32, #tpu.memory_space<vmem>>, vector<1x4x1x8xf32>
    %55 = vector.shape_cast %54 : vector<1x4x1x8xf32> to vector<4x1x8xf32>
    %56 = vector.broadcast %55 : vector<4x1x8xf32> to vector<4x8x8xf32>
    %57 = arith.addf %53, %56 : vector<4x8x8xf32>
    %c0_35 = arith.constant 0 : index
    %c0_36 = arith.constant 0 : index
    %c0_37 = arith.constant 0 : index
    %c0_38 = arith.constant 0 : index
    %58 = vector.load %arg10[%c0_35, %c0_36, %c0_37, %c0_38] : memref<2x4x32x8xbf16, #tpu.memory_space<vmem>>, vector<1x4x32x8xbf16>
    %59 = vector.shape_cast %58 : vector<1x4x32x8xbf16> to vector<4x32x8xbf16>
    "tpu.trace_start"() <{level = 10 : i32, message = "htc,hcd->htd"}> : () -> ()
    %cst_39 = arith.constant dense<0.000000e+00> : vector<4x8x8xf32>
    %60 = tpu.matmul %43, %59, %cst_39 {dimension_numbers = #tpu.dot_dimension_numbers<[2], [1], [1], [2], [0, 0, 0, 1, 1, 2], [0], [0]>} : vector<4x8x32xbf16>, vector<4x32x8xbf16>, vector<4x8x8xf32> -> vector<4x8x8xf32>
    "tpu.trace_stop"() : () -> ()
    %c0_40 = arith.constant 0 : index
    %c0_41 = arith.constant 0 : index
    %c0_42 = arith.constant 0 : index
    %c0_43 = arith.constant 0 : index
    %61 = vector.load %arg11[%c0_40, %c0_41, %c0_42, %c0_43] : memref<2x4x1x8xf32, #tpu.memory_space<vmem>>, vector<1x4x1x8xf32>
    %62 = vector.shape_cast %61 : vector<1x4x1x8xf32> to vector<4x1x8xf32>
    %63 = vector.broadcast %62 : vector<4x1x8xf32> to vector<4x8x8xf32>
    %64 = arith.addf %60, %63 : vector<4x8x8xf32>
    %65 = arith.truncf %50 : vector<4x8x8xf32> to vector<4x8x8xbf16>
    %66 = arith.truncf %57 : vector<4x8x8xf32> to vector<4x8x8xbf16>
    "tpu.trace_start"() <{level = 10 : i32, message = "htd,hsd->hts"}> : () -> ()
    %cst_44 = arith.constant dense<0.000000e+00> : vector<4x8x8xf32>
    %67 = tpu.matmul %65, %66, %cst_44 {dimension_numbers = #tpu.dot_dimension_numbers<[2], [2], [1], [1], [0, 0, 0, 1, 1, 1], [0], [0]>} : vector<4x8x8xbf16>, vector<4x8x8xbf16>, vector<4x8x8xf32> -> vector<4x8x8xf32>
    "tpu.trace_stop"() : () -> ()
    %cst_45 = arith.constant 0.353553385 : f32
    %68 = vector.broadcast %cst_45 : f32 to vector<4x8x8xf32>
    %69 = arith.mulf %67, %68 : vector<4x8x8xf32>
    %cst_46 = arith.constant -1.000000e+30 : f32
    %70 = vector.shape_cast %14 : vector<1x8x8xi1> to vector<1x8x8xi1>
    %71 = vector.broadcast %70 : vector<1x8x8xi1> to vector<4x8x8xi1>
    %72 = vector.broadcast %cst_46 : f32 to vector<4x8x8xf32>
    %73 = arith.select %71, %69, %72 : vector<4x8x8xi1>, vector<4x8x8xf32>
    %cst_47 = arith.constant dense<0xFF800000> : vector<4x8xf32>
    %74 = vector.multi_reduction <maximumf>, %73, %cst_47 [2] : vector<4x8x8xf32> to vector<4x8xf32>
    %75 = vector.shape_cast %74 : vector<4x8xf32> to vector<4x8x1xf32>
    %76 = vector.broadcast %75 : vector<4x8x1xf32> to vector<4x8x8xf32>
    %77 = arith.subf %73, %76 : vector<4x8x8xf32>
    %78 = math.exp %77 : vector<4x8x8xf32>
    %cst_48 = arith.constant dense<0.000000e+00> : vector<4x8xf32>
    %79 = vector.multi_reduction <add>, %78, %cst_48 [2] : vector<4x8x8xf32> to vector<4x8xf32>
    %80 = vector.shape_cast %79 : vector<4x8xf32> to vector<4x8x1xf32>
    %81 = tpu.reciprocal %80 {approx = true} : vector<4x8x1xf32> -> vector<4x8x1xf32>
    %82 = vector.broadcast %81 : vector<4x8x1xf32> to vector<4x8x8xf32>
    %83 = arith.mulf %78, %82 : vector<4x8x8xf32>
    %84 = arith.truncf %83 : vector<4x8x8xf32> to vector<4x8x8xbf16>
    %85 = arith.truncf %64 : vector<4x8x8xf32> to vector<4x8x8xbf16>
    "tpu.trace_start"() <{level = 10 : i32, message = "hts,hsd->htd"}> : () -> ()
    %cst_49 = arith.constant dense<0.000000e+00> : vector<4x8x8xf32>
    %86 = tpu.matmul %84, %85, %cst_49 {dimension_numbers = #tpu.dot_dimension_numbers<[2], [1], [1], [2], [0, 0, 0, 1, 1, 2], [0], [0]>} : vector<4x8x8xbf16>, vector<4x8x8xbf16>, vector<4x8x8xf32> -> vector<4x8x8xf32>
    "tpu.trace_stop"() : () -> ()
    %87 = arith.truncf %86 : vector<4x8x8xf32> to vector<4x8x8xbf16>
    %c0_50 = arith.constant 0 : index
    %c0_51 = arith.constant 0 : index
    %c0_52 = arith.constant 0 : index
    %c0_53 = arith.constant 0 : index
    %88 = vector.load %arg12[%c0_50, %c0_51, %c0_52, %c0_53] : memref<2x4x8x32xbf16, #tpu.memory_space<vmem>>, vector<1x4x8x32xbf16>
    %89 = vector.shape_cast %88 : vector<1x4x8x32xbf16> to vector<4x8x32xbf16>
    "tpu.trace_start"() <{level = 10 : i32, message = "htd,hdc->htc"}> : () -> ()
    %cst_54 = arith.constant dense<0.000000e+00> : vector<4x8x32xf32>
    %90 = tpu.matmul %87, %89, %cst_54 {dimension_numbers = #tpu.dot_dimension_numbers<[2], [1], [1], [2], [0, 0, 0, 1, 1, 2], [0], [0]>} : vector<4x8x8xbf16>, vector<4x8x32xbf16>, vector<4x8x32xf32> -> vector<4x8x32xf32>
    "tpu.trace_stop"() : () -> ()
    %cst_55 = arith.constant dense<0.000000e+00> : vector<8x32xf32>
    %91 = vector.multi_reduction <add>, %90, %cst_55 [0] : vector<4x8x32xf32> to vector<8x32xf32>
    %92 = arith.addf %10, %91 : vector<8x32xf32>
    %c0_56 = arith.constant 0 : index
    %c0_57 = arith.constant 0 : index
    %c0_58 = arith.constant 0 : index
    %93 = vector.load %arg13[%c0_56, %c0_57, %c0_58] : memref<2x1x32xf32, #tpu.memory_space<vmem>>, vector<1x1x32xf32>
    %94 = vector.shape_cast %93 : vector<1x1x32xf32> to vector<1x32xf32>
    %95 = vector.broadcast %94 : vector<1x32xf32> to vector<8x32xf32>
    %96 = arith.addf %92, %95 : vector<8x32xf32>
    %c0_59 = arith.constant 0 : index
    %c0_60 = arith.constant 0 : index
    %c0_61 = arith.constant 0 : index
    %97 = vector.load %arg14[%c0_59, %c0_60, %c0_61] : memref<2x1x32xf32, #tpu.memory_space<vmem>>, vector<1x1x32xf32>
    %98 = vector.shape_cast %97 : vector<1x1x32xf32> to vector<1x32xf32>
    %c0_62 = arith.constant 0 : index
    %c0_63 = arith.constant 0 : index
    %c0_64 = arith.constant 0 : index
    %99 = vector.load %arg15[%c0_62, %c0_63, %c0_64] : memref<2x1x32xf32, #tpu.memory_space<vmem>>, vector<1x1x32xf32>
    %100 = vector.shape_cast %99 : vector<1x1x32xf32> to vector<1x32xf32>
    %cst_65 = arith.constant dense<0.000000e+00> : vector<8xf32>
    %101 = vector.multi_reduction <add>, %96, %cst_65 [1] : vector<8x32xf32> to vector<8xf32>
    %102 = vector.shape_cast %101 : vector<8xf32> to vector<8x1xf32>
    %cst_66 = arith.constant 3.200000e+01 : f32
    %103 = vector.broadcast %cst_66 : f32 to vector<8x1xf32>
    %104 = arith.divf %102, %103 : vector<8x1xf32>
    %105 = vector.broadcast %104 : vector<8x1xf32> to vector<8x32xf32>
    %106 = arith.subf %96, %105 : vector<8x32xf32>
    %107 = arith.mulf %106, %106 : vector<8x32xf32>
    %cst_67 = arith.constant dense<0.000000e+00> : vector<8xf32>
    %108 = vector.multi_reduction <add>, %107, %cst_67 [1] : vector<8x32xf32> to vector<8xf32>
    %109 = vector.shape_cast %108 : vector<8xf32> to vector<8x1xf32>
    %cst_68 = arith.constant 3.200000e+01 : f32
    %110 = vector.broadcast %cst_68 : f32 to vector<8x1xf32>
    %111 = arith.divf %109, %110 : vector<8x1xf32>
    %112 = vector.broadcast %104 : vector<8x1xf32> to vector<8x32xf32>
    %113 = arith.subf %96, %112 : vector<8x32xf32>
    %cst_69 = arith.constant 9.99999974E-6 : f32
    %114 = vector.broadcast %cst_69 : f32 to vector<8x1xf32>
    %115 = arith.addf %111, %114 : vector<8x1xf32>
    %116 = math.rsqrt %115 : vector<8x1xf32>
    %117 = vector.broadcast %116 : vector<8x1xf32> to vector<8x32xf32>
    %118 = arith.mulf %113, %117 : vector<8x32xf32>
    %119 = vector.broadcast %98 : vector<1x32xf32> to vector<8x32xf32>
    %120 = arith.mulf %118, %119 : vector<8x32xf32>
    %121 = vector.broadcast %100 : vector<1x32xf32> to vector<8x32xf32>
    %122 = arith.addf %120, %121 : vector<8x32xf32>
    %123 = arith.truncf %122 : vector<8x32xf32> to vector<8x32xbf16>
    %c0_70 = arith.constant 0 : index
    %c0_71 = arith.constant 0 : index
    %c0_72 = arith.constant 0 : index
    %124 = vector.load %arg16[%c0_70, %c0_71, %c0_72] : memref<2x32x128xbf16, #tpu.memory_space<vmem>>, vector<1x32x128xbf16>
    %125 = vector.shape_cast %124 : vector<1x32x128xbf16> to vector<32x128xbf16>
    %cst_73 = arith.constant dense<0.000000e+00> : vector<8x128xf32>
    %126 = tpu.matmul %123, %125, %cst_73 {dimension_numbers = #tpu.dot_dimension_numbers<[1], [0], [0], [1], [0, 0, 1, 1], [], []>} : vector<8x32xbf16>, vector<32x128xbf16>, vector<8x128xf32> -> vector<8x128xf32>
    %c0_74 = arith.constant 0 : index
    %c0_75 = arith.constant 0 : index
    %c0_76 = arith.constant 0 : index
    %127 = vector.load %arg17[%c0_74, %c0_75, %c0_76] : memref<2x1x128xf32, #tpu.memory_space<vmem>>, vector<1x1x128xf32>
    %128 = vector.shape_cast %127 : vector<1x1x128xf32> to vector<1x128xf32>
    %129 = vector.broadcast %128 : vector<1x128xf32> to vector<8x128xf32>
    %130 = arith.addf %126, %129 : vector<8x128xf32>
    %cst_77 = arith.constant 5.000000e-01 : f32
    %131 = vector.broadcast %cst_77 : f32 to vector<8x128xf32>
    %132 = arith.mulf %131, %130 : vector<8x128xf32>
    %cst_78 = arith.constant 4.471500e-02 : f32
    %133 = vector.broadcast %cst_78 : f32 to vector<8x128xf32>
    %134 = arith.mulf %133, %130 : vector<8x128xf32>
    %135 = arith.mulf %134, %130 : vector<8x128xf32>
    %136 = arith.mulf %135, %130 : vector<8x128xf32>
    %137 = arith.addf %130, %136 : vector<8x128xf32>
    %cst_79 = arith.constant 0.797884583 : f32
    %138 = vector.broadcast %cst_79 : f32 to vector<8x128xf32>
    %139 = arith.mulf %138, %137 : vector<8x128xf32>
    %140 = math.tanh %139 : vector<8x128xf32>
    %cst_80 = arith.constant 1.000000e+00 : f32
    %141 = vector.broadcast %cst_80 : f32 to vector<8x128xf32>
    %142 = arith.addf %141, %140 : vector<8x128xf32>
    %143 = arith.mulf %132, %142 : vector<8x128xf32>
    %144 = arith.truncf %143 : vector<8x128xf32> to vector<8x128xbf16>
    %c0_81 = arith.constant 0 : index
    %c0_82 = arith.constant 0 : index
    %c0_83 = arith.constant 0 : index
    %145 = vector.load %arg18[%c0_81, %c0_82, %c0_83] : memref<2x128x32xbf16, #tpu.memory_space<vmem>>, vector<1x128x32xbf16>
    %146 = vector.shape_cast %145 : vector<1x128x32xbf16> to vector<128x32xbf16>
    %cst_84 = arith.constant dense<0.000000e+00> : vector<8x32xf32>
    %147 = tpu.matmul %144, %146, %cst_84 {dimension_numbers = #tpu.dot_dimension_numbers<[1], [0], [0], [1], [0, 0, 1, 1], [], []>} : vector<8x128xbf16>, vector<128x32xbf16>, vector<8x32xf32> -> vector<8x32xf32>
    %c0_85 = arith.constant 0 : index
    %c0_86 = arith.constant 0 : index
    %c0_87 = arith.constant 0 : index
    %148 = vector.load %arg19[%c0_85, %c0_86, %c0_87] : memref<2x1x32xf32, #tpu.memory_space<vmem>>, vector<1x1x32xf32>
    %149 = vector.shape_cast %148 : vector<1x1x32xf32> to vector<1x32xf32>
    %150 = vector.broadcast %149 : vector<1x32xf32> to vector<8x32xf32>
    %151 = arith.addf %147, %150 : vector<8x32xf32>
    %152 = arith.addf %96, %151 : vector<8x32xf32>
    %c1 = arith.constant 1 : index
    %c0_88 = arith.constant 0 : index
    %c0_89 = arith.constant 0 : index
    %153 = vector.load %arg4[%c1, %c0_88, %c0_89] : memref<2x1x32xf32, #tpu.memory_space<vmem>>, vector<1x1x32xf32>
    %154 = vector.shape_cast %153 : vector<1x1x32xf32> to vector<1x32xf32>
    %c1_90 = arith.constant 1 : index
    %c0_91 = arith.constant 0 : index
    %c0_92 = arith.constant 0 : index
    %155 = vector.load %arg5[%c1_90, %c0_91, %c0_92] : memref<2x1x32xf32, #tpu.memory_space<vmem>>, vector<1x1x32xf32>
    %156 = vector.shape_cast %155 : vector<1x1x32xf32> to vector<1x32xf32>
    %cst_93 = arith.constant dense<0.000000e+00> : vector<8xf32>
    %157 = vector.multi_reduction <add>, %152, %cst_93 [1] : vector<8x32xf32> to vector<8xf32>
    %158 = vector.shape_cast %157 : vector<8xf32> to vector<8x1xf32>
    %cst_94 = arith.constant 3.200000e+01 : f32
    %159 = vector.broadcast %cst_94 : f32 to vector<8x1xf32>
    %160 = arith.divf %158, %159 : vector<8x1xf32>
    %161 = vector.broadcast %160 : vector<8x1xf32> to vector<8x32xf32>
    %162 = arith.subf %152, %161 : vector<8x32xf32>
    %163 = arith.mulf %162, %162 : vector<8x32xf32>
    %cst_95 = arith.constant dense<0.000000e+00> : vector<8xf32>
    %164 = vector.multi_reduction <add>, %163, %cst_95 [1] : vector<8x32xf32> to vector<8xf32>
    %165 = vector.shape_cast %164 : vector<8xf32> to vector<8x1xf32>
    %cst_96 = arith.constant 3.200000e+01 : f32
    %166 = vector.broadcast %cst_96 : f32 to vector<8x1xf32>
    %167 = arith.divf %165, %166 : vector<8x1xf32>
    %168 = vector.broadcast %160 : vector<8x1xf32> to vector<8x32xf32>
    %169 = arith.subf %152, %168 : vector<8x32xf32>
    %cst_97 = arith.constant 9.99999974E-6 : f32
    %170 = vector.broadcast %cst_97 : f32 to vector<8x1xf32>
    %171 = arith.addf %167, %170 : vector<8x1xf32>
    %172 = math.rsqrt %171 : vector<8x1xf32>
    %173 = vector.broadcast %172 : vector<8x1xf32> to vector<8x32xf32>
    %174 = arith.mulf %169, %173 : vector<8x32xf32>
    %175 = vector.broadcast %154 : vector<1x32xf32> to vector<8x32xf32>
    %176 = arith.mulf %174, %175 : vector<8x32xf32>
    %177 = vector.broadcast %156 : vector<1x32xf32> to vector<8x32xf32>
    %178 = arith.addf %176, %177 : vector<8x32xf32>
    %179 = arith.truncf %178 : vector<8x32xf32> to vector<8x32xbf16>
    %180 = vector.shape_cast %179 : vector<8x32xbf16> to vector<1x8x32xbf16>
    %181 = vector.broadcast %180 : vector<1x8x32xbf16> to vector<4x8x32xbf16>
    %c1_98 = arith.constant 1 : index
    %c0_99 = arith.constant 0 : index
    %c0_100 = arith.constant 0 : index
    %c0_101 = arith.constant 0 : index
    %182 = vector.load %arg6[%c1_98, %c0_99, %c0_100, %c0_101] : memref<2x4x32x8xbf16, #tpu.memory_space<vmem>>, vector<1x4x32x8xbf16>
    %183 = vector.shape_cast %182 : vector<1x4x32x8xbf16> to vector<4x32x8xbf16>
    "tpu.trace_start"() <{level = 10 : i32, message = "htc,hcd->htd"}> : () -> ()
    %cst_102 = arith.constant dense<0.000000e+00> : vector<4x8x8xf32>
    %184 = tpu.matmul %181, %183, %cst_102 {dimension_numbers = #tpu.dot_dimension_numbers<[2], [1], [1], [2], [0, 0, 0, 1, 1, 2], [0], [0]>} : vector<4x8x32xbf16>, vector<4x32x8xbf16>, vector<4x8x8xf32> -> vector<4x8x8xf32>
    "tpu.trace_stop"() : () -> ()
    %c1_103 = arith.constant 1 : index
    %c0_104 = arith.constant 0 : index
    %c0_105 = arith.constant 0 : index
    %c0_106 = arith.constant 0 : index
    %185 = vector.load %arg7[%c1_103, %c0_104, %c0_105, %c0_106] : memref<2x4x1x8xf32, #tpu.memory_space<vmem>>, vector<1x4x1x8xf32>
    %186 = vector.shape_cast %185 : vector<1x4x1x8xf32> to vector<4x1x8xf32>
    %187 = vector.broadcast %186 : vector<4x1x8xf32> to vector<4x8x8xf32>
    %188 = arith.addf %184, %187 : vector<4x8x8xf32>
    %c1_107 = arith.constant 1 : index
    %c0_108 = arith.constant 0 : index
    %c0_109 = arith.constant 0 : index
    %c0_110 = arith.constant 0 : index
    %189 = vector.load %arg8[%c1_107, %c0_108, %c0_109, %c0_110] : memref<2x4x32x8xbf16, #tpu.memory_space<vmem>>, vector<1x4x32x8xbf16>
    %190 = vector.shape_cast %189 : vector<1x4x32x8xbf16> to vector<4x32x8xbf16>
    "tpu.trace_start"() <{level = 10 : i32, message = "htc,hcd->htd"}> : () -> ()
    %cst_111 = arith.constant dense<0.000000e+00> : vector<4x8x8xf32>
    %191 = tpu.matmul %181, %190, %cst_111 {dimension_numbers = #tpu.dot_dimension_numbers<[2], [1], [1], [2], [0, 0, 0, 1, 1, 2], [0], [0]>} : vector<4x8x32xbf16>, vector<4x32x8xbf16>, vector<4x8x8xf32> -> vector<4x8x8xf32>
    "tpu.trace_stop"() : () -> ()
    %c1_112 = arith.constant 1 : index
    %c0_113 = arith.constant 0 : index
    %c0_114 = arith.constant 0 : index
    %c0_115 = arith.constant 0 : index
    %192 = vector.load %arg9[%c1_112, %c0_113, %c0_114, %c0_115] : memref<2x4x1x8xf32, #tpu.memory_space<vmem>>, vector<1x4x1x8xf32>
    %193 = vector.shape_cast %192 : vector<1x4x1x8xf32> to vector<4x1x8xf32>
    %194 = vector.broadcast %193 : vector<4x1x8xf32> to vector<4x8x8xf32>
    %195 = arith.addf %191, %194 : vector<4x8x8xf32>
    %c1_116 = arith.constant 1 : index
    %c0_117 = arith.constant 0 : index
    %c0_118 = arith.constant 0 : index
    %c0_119 = arith.constant 0 : index
    %196 = vector.load %arg10[%c1_116, %c0_117, %c0_118, %c0_119] : memref<2x4x32x8xbf16, #tpu.memory_space<vmem>>, vector<1x4x32x8xbf16>
    %197 = vector.shape_cast %196 : vector<1x4x32x8xbf16> to vector<4x32x8xbf16>
    "tpu.trace_start"() <{level = 10 : i32, message = "htc,hcd->htd"}> : () -> ()
    %cst_120 = arith.constant dense<0.000000e+00> : vector<4x8x8xf32>
    %198 = tpu.matmul %181, %197, %cst_120 {dimension_numbers = #tpu.dot_dimension_numbers<[2], [1], [1], [2], [0, 0, 0, 1, 1, 2], [0], [0]>} : vector<4x8x32xbf16>, vector<4x32x8xbf16>, vector<4x8x8xf32> -> vector<4x8x8xf32>
    "tpu.trace_stop"() : () -> ()
    %c1_121 = arith.constant 1 : index
    %c0_122 = arith.constant 0 : index
    %c0_123 = arith.constant 0 : index
    %c0_124 = arith.constant 0 : index
    %199 = vector.load %arg11[%c1_121, %c0_122, %c0_123, %c0_124] : memref<2x4x1x8xf32, #tpu.memory_space<vmem>>, vector<1x4x1x8xf32>
    %200 = vector.shape_cast %199 : vector<1x4x1x8xf32> to vector<4x1x8xf32>
    %201 = vector.broadcast %200 : vector<4x1x8xf32> to vector<4x8x8xf32>
    %202 = arith.addf %198, %201 : vector<4x8x8xf32>
    %203 = arith.truncf %188 : vector<4x8x8xf32> to vector<4x8x8xbf16>
    %204 = arith.truncf %195 : vector<4x8x8xf32> to vector<4x8x8xbf16>
    "tpu.trace_start"() <{level = 10 : i32, message = "htd,hsd->hts"}> : () -> ()
    %cst_125 = arith.constant dense<0.000000e+00> : vector<4x8x8xf32>
    %205 = tpu.matmul %203, %204, %cst_125 {dimension_numbers = #tpu.dot_dimension_numbers<[2], [2], [1], [1], [0, 0, 0, 1, 1, 1], [0], [0]>} : vector<4x8x8xbf16>, vector<4x8x8xbf16>, vector<4x8x8xf32> -> vector<4x8x8xf32>
    "tpu.trace_stop"() : () -> ()
    %cst_126 = arith.constant 0.353553385 : f32
    %206 = vector.broadcast %cst_126 : f32 to vector<4x8x8xf32>
    %207 = arith.mulf %205, %206 : vector<4x8x8xf32>
    %cst_127 = arith.constant -1.000000e+30 : f32
    %208 = vector.shape_cast %14 : vector<1x8x8xi1> to vector<1x8x8xi1>
    %209 = vector.broadcast %208 : vector<1x8x8xi1> to vector<4x8x8xi1>
    %210 = vector.broadcast %cst_127 : f32 to vector<4x8x8xf32>
    %211 = arith.select %209, %207, %210 : vector<4x8x8xi1>, vector<4x8x8xf32>
    %cst_128 = arith.constant dense<0xFF800000> : vector<4x8xf32>
    %212 = vector.multi_reduction <maximumf>, %211, %cst_128 [2] : vector<4x8x8xf32> to vector<4x8xf32>
    %213 = vector.shape_cast %212 : vector<4x8xf32> to vector<4x8x1xf32>
    %214 = vector.broadcast %213 : vector<4x8x1xf32> to vector<4x8x8xf32>
    %215 = arith.subf %211, %214 : vector<4x8x8xf32>
    %216 = math.exp %215 : vector<4x8x8xf32>
    %cst_129 = arith.constant dense<0.000000e+00> : vector<4x8xf32>
    %217 = vector.multi_reduction <add>, %216, %cst_129 [2] : vector<4x8x8xf32> to vector<4x8xf32>
    %218 = vector.shape_cast %217 : vector<4x8xf32> to vector<4x8x1xf32>
    %219 = tpu.reciprocal %218 {approx = true} : vector<4x8x1xf32> -> vector<4x8x1xf32>
    %220 = vector.broadcast %219 : vector<4x8x1xf32> to vector<4x8x8xf32>
    %221 = arith.mulf %216, %220 : vector<4x8x8xf32>
    %222 = arith.truncf %221 : vector<4x8x8xf32> to vector<4x8x8xbf16>
    %223 = arith.truncf %202 : vector<4x8x8xf32> to vector<4x8x8xbf16>
    "tpu.trace_start"() <{level = 10 : i32, message = "hts,hsd->htd"}> : () -> ()
    %cst_130 = arith.constant dense<0.000000e+00> : vector<4x8x8xf32>
    %224 = tpu.matmul %222, %223, %cst_130 {dimension_numbers = #tpu.dot_dimension_numbers<[2], [1], [1], [2], [0, 0, 0, 1, 1, 2], [0], [0]>} : vector<4x8x8xbf16>, vector<4x8x8xbf16>, vector<4x8x8xf32> -> vector<4x8x8xf32>
    "tpu.trace_stop"() : () -> ()
    %225 = arith.truncf %224 : vector<4x8x8xf32> to vector<4x8x8xbf16>
    %c1_131 = arith.constant 1 : index
    %c0_132 = arith.constant 0 : index
    %c0_133 = arith.constant 0 : index
    %c0_134 = arith.constant 0 : index
    %226 = vector.load %arg12[%c1_131, %c0_132, %c0_133, %c0_134] : memref<2x4x8x32xbf16, #tpu.memory_space<vmem>>, vector<1x4x8x32xbf16>
    %227 = vector.shape_cast %226 : vector<1x4x8x32xbf16> to vector<4x8x32xbf16>
    "tpu.trace_start"() <{level = 10 : i32, message = "htd,hdc->htc"}> : () -> ()
    %cst_135 = arith.constant dense<0.000000e+00> : vector<4x8x32xf32>
    %228 = tpu.matmul %225, %227, %cst_135 {dimension_numbers = #tpu.dot_dimension_numbers<[2], [1], [1], [2], [0, 0, 0, 1, 1, 2], [0], [0]>} : vector<4x8x8xbf16>, vector<4x8x32xbf16>, vector<4x8x32xf32> -> vector<4x8x32xf32>
    "tpu.trace_stop"() : () -> ()
    %cst_136 = arith.constant dense<0.000000e+00> : vector<8x32xf32>
    %229 = vector.multi_reduction <add>, %228, %cst_136 [0] : vector<4x8x32xf32> to vector<8x32xf32>
    %230 = arith.addf %152, %229 : vector<8x32xf32>
    %c1_137 = arith.constant 1 : index
    %c0_138 = arith.constant 0 : index
    %c0_139 = arith.constant 0 : index
    %231 = vector.load %arg13[%c1_137, %c0_138, %c0_139] : memref<2x1x32xf32, #tpu.memory_space<vmem>>, vector<1x1x32xf32>
    %232 = vector.shape_cast %231 : vector<1x1x32xf32> to vector<1x32xf32>
    %233 = vector.broadcast %232 : vector<1x32xf32> to vector<8x32xf32>
    %234 = arith.addf %230, %233 : vector<8x32xf32>
    %c1_140 = arith.constant 1 : index
    %c0_141 = arith.constant 0 : index
    %c0_142 = arith.constant 0 : index
    %235 = vector.load %arg14[%c1_140, %c0_141, %c0_142] : memref<2x1x32xf32, #tpu.memory_space<vmem>>, vector<1x1x32xf32>
    %236 = vector.shape_cast %235 : vector<1x1x32xf32> to vector<1x32xf32>
    %c1_143 = arith.constant 1 : index
    %c0_144 = arith.constant 0 : index
    %c0_145 = arith.constant 0 : index
    %237 = vector.load %arg15[%c1_143, %c0_144, %c0_145] : memref<2x1x32xf32, #tpu.memory_space<vmem>>, vector<1x1x32xf32>
    %238 = vector.shape_cast %237 : vector<1x1x32xf32> to vector<1x32xf32>
    %cst_146 = arith.constant dense<0.000000e+00> : vector<8xf32>
    %239 = vector.multi_reduction <add>, %234, %cst_146 [1] : vector<8x32xf32> to vector<8xf32>
    %240 = vector.shape_cast %239 : vector<8xf32> to vector<8x1xf32>
    %cst_147 = arith.constant 3.200000e+01 : f32
    %241 = vector.broadcast %cst_147 : f32 to vector<8x1xf32>
    %242 = arith.divf %240, %241 : vector<8x1xf32>
    %243 = vector.broadcast %242 : vector<8x1xf32> to vector<8x32xf32>
    %244 = arith.subf %234, %243 : vector<8x32xf32>
    %245 = arith.mulf %244, %244 : vector<8x32xf32>
    %cst_148 = arith.constant dense<0.000000e+00> : vector<8xf32>
    %246 = vector.multi_reduction <add>, %245, %cst_148 [1] : vector<8x32xf32> to vector<8xf32>
    %247 = vector.shape_cast %246 : vector<8xf32> to vector<8x1xf32>
    %cst_149 = arith.constant 3.200000e+01 : f32
    %248 = vector.broadcast %cst_149 : f32 to vector<8x1xf32>
    %249 = arith.divf %247, %248 : vector<8x1xf32>
    %250 = vector.broadcast %242 : vector<8x1xf32> to vector<8x32xf32>
    %251 = arith.subf %234, %250 : vector<8x32xf32>
    %cst_150 = arith.constant 9.99999974E-6 : f32
    %252 = vector.broadcast %cst_150 : f32 to vector<8x1xf32>
    %253 = arith.addf %249, %252 : vector<8x1xf32>
    %254 = math.rsqrt %253 : vector<8x1xf32>
    %255 = vector.broadcast %254 : vector<8x1xf32> to vector<8x32xf32>
    %256 = arith.mulf %251, %255 : vector<8x32xf32>
    %257 = vector.broadcast %236 : vector<1x32xf32> to vector<8x32xf32>
    %258 = arith.mulf %256, %257 : vector<8x32xf32>
    %259 = vector.broadcast %238 : vector<1x32xf32> to vector<8x32xf32>
    %260 = arith.addf %258, %259 : vector<8x32xf32>
    %261 = arith.truncf %260 : vector<8x32xf32> to vector<8x32xbf16>
    %c1_151 = arith.constant 1 : index
    %c0_152 = arith.constant 0 : index
    %c0_153 = arith.constant 0 : index
    %262 = vector.load %arg16[%c1_151, %c0_152, %c0_153] : memref<2x32x128xbf16, #tpu.memory_space<vmem>>, vector<1x32x128xbf16>
    %263 = vector.shape_cast %262 : vector<1x32x128xbf16> to vector<32x128xbf16>
    %cst_154 = arith.constant dense<0.000000e+00> : vector<8x128xf32>
    %264 = tpu.matmul %261, %263, %cst_154 {dimension_numbers = #tpu.dot_dimension_numbers<[1], [0], [0], [1], [0, 0, 1, 1], [], []>} : vector<8x32xbf16>, vector<32x128xbf16>, vector<8x128xf32> -> vector<8x128xf32>
    %c1_155 = arith.constant 1 : index
    %c0_156 = arith.constant 0 : index
    %c0_157 = arith.constant 0 : index
    %265 = vector.load %arg17[%c1_155, %c0_156, %c0_157] : memref<2x1x128xf32, #tpu.memory_space<vmem>>, vector<1x1x128xf32>
    %266 = vector.shape_cast %265 : vector<1x1x128xf32> to vector<1x128xf32>
    %267 = vector.broadcast %266 : vector<1x128xf32> to vector<8x128xf32>
    %268 = arith.addf %264, %267 : vector<8x128xf32>
    %cst_158 = arith.constant 5.000000e-01 : f32
    %269 = vector.broadcast %cst_158 : f32 to vector<8x128xf32>
    %270 = arith.mulf %269, %268 : vector<8x128xf32>
    %cst_159 = arith.constant 4.471500e-02 : f32
    %271 = vector.broadcast %cst_159 : f32 to vector<8x128xf32>
    %272 = arith.mulf %271, %268 : vector<8x128xf32>
    %273 = arith.mulf %272, %268 : vector<8x128xf32>
    %274 = arith.mulf %273, %268 : vector<8x128xf32>
    %275 = arith.addf %268, %274 : vector<8x128xf32>
    %cst_160 = arith.constant 0.797884583 : f32
    %276 = vector.broadcast %cst_160 : f32 to vector<8x128xf32>
    %277 = arith.mulf %276, %275 : vector<8x128xf32>
    %278 = math.tanh %277 : vector<8x128xf32>
    %cst_161 = arith.constant 1.000000e+00 : f32
    %279 = vector.broadcast %cst_161 : f32 to vector<8x128xf32>
    %280 = arith.addf %279, %278 : vector<8x128xf32>
    %281 = arith.mulf %270, %280 : vector<8x128xf32>
    %282 = arith.truncf %281 : vector<8x128xf32> to vector<8x128xbf16>
    %c1_162 = arith.constant 1 : index
    %c0_163 = arith.constant 0 : index
    %c0_164 = arith.constant 0 : index
    %283 = vector.load %arg18[%c1_162, %c0_163, %c0_164] : memref<2x128x32xbf16, #tpu.memory_space<vmem>>, vector<1x128x32xbf16>
    %284 = vector.shape_cast %283 : vector<1x128x32xbf16> to vector<128x32xbf16>
    %cst_165 = arith.constant dense<0.000000e+00> : vector<8x32xf32>
    %285 = tpu.matmul %282, %284, %cst_165 {dimension_numbers = #tpu.dot_dimension_numbers<[1], [0], [0], [1], [0, 0, 1, 1], [], []>} : vector<8x128xbf16>, vector<128x32xbf16>, vector<8x32xf32> -> vector<8x32xf32>
    %c1_166 = arith.constant 1 : index
    %c0_167 = arith.constant 0 : index
    %c0_168 = arith.constant 0 : index
    %286 = vector.load %arg19[%c1_166, %c0_167, %c0_168] : memref<2x1x32xf32, #tpu.memory_space<vmem>>, vector<1x1x32xf32>
    %287 = vector.shape_cast %286 : vector<1x1x32xf32> to vector<1x32xf32>
    %288 = vector.broadcast %287 : vector<1x32xf32> to vector<8x32xf32>
    %289 = arith.addf %285, %288 : vector<8x32xf32>
    %290 = arith.addf %234, %289 : vector<8x32xf32>
    %c0_169 = arith.constant 0 : index
    %c0_170 = arith.constant 0 : index
    %291 = vector.load %arg20[%c0_169, %c0_170] : memref<1x32xf32, #tpu.memory_space<vmem>>, vector<1x32xf32>
    %c0_171 = arith.constant 0 : index
    %c0_172 = arith.constant 0 : index
    %292 = vector.load %arg21[%c0_171, %c0_172] : memref<1x32xf32, #tpu.memory_space<vmem>>, vector<1x32xf32>
    %cst_173 = arith.constant dense<0.000000e+00> : vector<8xf32>
    %293 = vector.multi_reduction <add>, %290, %cst_173 [1] : vector<8x32xf32> to vector<8xf32>
    %294 = vector.shape_cast %293 : vector<8xf32> to vector<8x1xf32>
    %cst_174 = arith.constant 3.200000e+01 : f32
    %295 = vector.broadcast %cst_174 : f32 to vector<8x1xf32>
    %296 = arith.divf %294, %295 : vector<8x1xf32>
    %297 = vector.broadcast %296 : vector<8x1xf32> to vector<8x32xf32>
    %298 = arith.subf %290, %297 : vector<8x32xf32>
    %299 = arith.mulf %298, %298 : vector<8x32xf32>
    %cst_175 = arith.constant dense<0.000000e+00> : vector<8xf32>
    %300 = vector.multi_reduction <add>, %299, %cst_175 [1] : vector<8x32xf32> to vector<8xf32>
    %301 = vector.shape_cast %300 : vector<8xf32> to vector<8x1xf32>
    %cst_176 = arith.constant 3.200000e+01 : f32
    %302 = vector.broadcast %cst_176 : f32 to vector<8x1xf32>
    %303 = arith.divf %301, %302 : vector<8x1xf32>
    %304 = vector.broadcast %296 : vector<8x1xf32> to vector<8x32xf32>
    %305 = arith.subf %290, %304 : vector<8x32xf32>
    %cst_177 = arith.constant 9.99999974E-6 : f32
    %306 = vector.broadcast %cst_177 : f32 to vector<8x1xf32>
    %307 = arith.addf %303, %306 : vector<8x1xf32>
    %308 = math.rsqrt %307 : vector<8x1xf32>
    %309 = vector.broadcast %308 : vector<8x1xf32> to vector<8x32xf32>
    %310 = arith.mulf %305, %309 : vector<8x32xf32>
    %311 = vector.broadcast %291 : vector<1x32xf32> to vector<8x32xf32>
    %312 = arith.mulf %310, %311 : vector<8x32xf32>
    %313 = vector.broadcast %292 : vector<1x32xf32> to vector<8x32xf32>
    %314 = arith.addf %312, %313 : vector<8x32xf32>
    %315 = arith.truncf %314 : vector<8x32xf32> to vector<8x32xbf16>
    %c0_178 = arith.constant 0 : index
    %c0_179 = arith.constant 0 : index
    %316 = vector.load %arg22[%c0_178, %c0_179] : memref<32x256xbf16, #tpu.memory_space<vmem>>, vector<32x256xbf16>
    %cst_180 = arith.constant dense<0.000000e+00> : vector<8x256xf32>
    %317 = tpu.matmul %315, %316, %cst_180 {dimension_numbers = #tpu.dot_dimension_numbers<[1], [0], [0], [1], [0, 0, 1, 1], [], []>} : vector<8x32xbf16>, vector<32x256xbf16>, vector<8x256xf32> -> vector<8x256xf32>
    %c0_181 = arith.constant 0 : index
    %c0_182 = arith.constant 0 : index
    %c0_183 = arith.constant 0 : index
    %318 = vector.load %arg23[%c0_181, %c0_182, %c0_183] : memref<1x8x256xf32, #tpu.memory_space<vmem>>, vector<1x8x256xf32>
    %319 = vector.shape_cast %318 : vector<1x8x256xf32> to vector<8x256xf32>
    %320 = vector.shape_cast %317 : vector<8x256xf32> to vector<1x8x256xf32>
    tpu.vector_store %arg23[%c0_181, %c0_182, %c0_183], %320 {strides = array<i32>} : memref<1x8x256xf32, #tpu.memory_space<vmem>>, vector<1x8x256xf32>,
    return
  }
  func.func @transform_0(%arg0: i32) -> (i32, i32, i32) {
    %c0_i32 = arith.constant 0 : i32
    %c0_i32_0 = arith.constant 0 : i32
    %c0_i32_1 = arith.constant 0 : i32
    return %arg0, %c0_i32, %c0_i32_0 : i32, i32, i32
  }
  func.func @transform_1(%arg0: i32) -> (i32, i32) {
    %c0_i32 = arith.constant 0 : i32
    %c0_i32_0 = arith.constant 0 : i32
    %c0_i32_1 = arith.constant 0 : i32
    return %c0_i32, %c0_i32_0 : i32, i32
  }
  func.func @transform_2(%arg0: i32) -> (i32, i32) {
    %c0_i32 = arith.constant 0 : i32
    %c0_i32_0 = arith.constant 0 : i32
    %c0_i32_1 = arith.constant 0 : i32
    return %c0_i32, %c0_i32_0 : i32, i32
  }
  func.func @transform_3(%arg0: i32) -> (i32, i32, i32) {
    %c0_i32 = arith.constant 0 : i32
    %c0_i32_0 = arith.constant 0 : i32
    %c0_i32_1 = arith.constant 0 : i32
    %c0_i32_2 = arith.constant 0 : i32
    return %c0_i32, %c0_i32_0, %c0_i32_1 : i32, i32, i32
  }
  func.func @transform_4(%arg0: i32) -> (i32, i32, i32) {
    %c0_i32 = arith.constant 0 : i32
    %c0_i32_0 = arith.constant 0 : i32
    %c0_i32_1 = arith.constant 0 : i32
    %c0_i32_2 = arith.constant 0 : i32
    return %c0_i32, %c0_i32_0, %c0_i32_1 : i32, i32, i32
  }
  func.func @transform_5(%arg0: i32) -> (i32, i32, i32, i32) {
    %c0_i32 = arith.constant 0 : i32
    %c0_i32_0 = arith.constant 0 : i32
    %c0_i32_1 = arith.constant 0 : i32
    %c0_i32_2 = arith.constant 0 : i32
    %c0_i32_3 = arith.constant 0 : i32
    return %c0_i32, %c0_i32_0, %c0_i32_1, %c0_i32_2 : i32, i32, i32, i32
  }
  func.func @transform_6(%arg0: i32) -> (i32, i32, i32, i32) {
    %c0_i32 = arith.constant 0 : i32
    %c0_i32_0 = arith.constant 0 : i32
    %c0_i32_1 = arith.constant 0 : i32
    %c0_i32_2 = arith.constant 0 : i32
    %c0_i32_3 = arith.constant 0 : i32
    return %c0_i32, %c0_i32_0, %c0_i32_1, %c0_i32_2 : i32, i32, i32, i32
  }
  func.func @transform_7(%arg0: i32) -> (i32, i32, i32, i32) {
    %c0_i32 = arith.constant 0 : i32
    %c0_i32_0 = arith.constant 0 : i32
    %c0_i32_1 = arith.constant 0 : i32
    %c0_i32_2 = arith.constant 0 : i32
    %c0_i32_3 = arith.constant 0 : i32
    return %c0_i32, %c0_i32_0, %c0_i32_1, %c0_i32_2 : i32, i32, i32, i32
  }
  func.func @transform_8(%arg0: i32) -> (i32, i32, i32, i32) {
    %c0_i32 = arith.constant 0 : i32
    %c0_i32_0 = arith.constant 0 : i32
    %c0_i32_1 = arith.constant 0 : i32
    %c0_i32_2 = arith.constant 0 : i32
    %c0_i32_3 = arith.constant 0 : i32
    return %c0_i32, %c0_i32_0, %c0_i32_1, %c0_i32_2 : i32, i32, i32, i32
  }
  func.func @transform_9(%arg0: i32) -> (i32, i32, i32, i32) {
    %c0_i32 = arith.constant 0 : i32
    %c0_i32_0 = arith.constant 0 : i32
    %c0_i32_1 = arith.constant 0 : i32
    %c0_i32_2 = arith.constant 0 : i32
    %c0_i32_3 = arith.constant 0 : i32
    return %c0_i32, %c0_i32_0, %c0_i32_1, %c0_i32_2 : i32, i32, i32, i32
  }
  func.func @transform_10(%arg0: i32) -> (i32, i32, i32, i32) {
    %c0_i32 = arith.constant 0 : i32
    %c0_i32_0 = arith.constant 0 : i32
    %c0_i32_1 = arith.constant 0 : i32
    %c0_i32_2 = arith.constant 0 : i32
    %c0_i32_3 = arith.constant 0 : i32
    return %c0_i32, %c0_i32_0, %c0_i32_1, %c0_i32_2 : i32, i32, i32, i32
  }
  func.func @transform_11(%arg0: i32) -> (i32, i32, i32, i32) {
    %c0_i32 = arith.constant 0 : i32
    %c0_i32_0 = arith.constant 0 : i32
    %c0_i32_1 = arith.constant 0 : i32
    %c0_i32_2 = arith.constant 0 : i32
    %c0_i32_3 = arith.constant 0 : i32
    return %c0_i32, %c0_i32_0, %c0_i32_1, %c0_i32_2 : i32, i32, i32, i32
  }
  func.func @transform_12(%arg0: i32) -> (i32, i32, i32) {
    %c0_i32 = arith.constant 0 : i32
    %c0_i32_0 = arith.constant 0 : i32
    %c0_i32_1 = arith.constant 0 : i32
    %c0_i32_2 = arith.constant 0 : i32
    return %c0_i32, %c0_i32_0, %c0_i32_1 : i32, i32, i32
  }
  func.func @transform_13(%arg0: i32) -> (i32, i32, i32) {
    %c0_i32 = arith.constant 0 : i32
    %c0_i32_0 = arith.constant 0 : i32
    %c0_i32_1 = arith.constant 0 : i32
    %c0_i32_2 = arith.constant 0 : i32
    return %c0_i32, %c0_i32_0, %c0_i32_1 : i32, i32, i32
  }
  func.func @transform_14(%arg0: i32) -> (i32, i32, i32) {
    %c0_i32 = arith.constant 0 : i32
    %c0_i32_0 = arith.constant 0 : i32
    %c0_i32_1 = arith.constant 0 : i32
    %c0_i32_2 = arith.constant 0 : i32
    return %c0_i32, %c0_i32_0, %c0_i32_1 : i32, i32, i32
  }
  func.func @transform_15(%arg0: i32) -> (i32, i32, i32) {
    %c0_i32 = arith.constant 0 : i32
    %c0_i32_0 = arith.constant 0 : i32
    %c0_i32_1 = arith.constant 0 : i32
    %c0_i32_2 = arith.constant 0 : i32
    return %c0_i32, %c0_i32_0, %c0_i32_1 : i32, i32, i32
  }
  func.func @transform_16(%arg0: i32) -> (i32, i32, i32) {
    %c0_i32 = arith.constant 0 : i32
    %c0_i32_0 = arith.constant 0 : i32
    %c0_i32_1 = arith.constant 0 : i32
    %c0_i32_2 = arith.constant 0 : i32
    return %c0_i32, %c0_i32_0, %c0_i32_1 : i32, i32, i32
  }
  func.func @transform_17(%arg0: i32) -> (i32, i32, i32) {
    %c0_i32 = arith.constant 0 : i32
    %c0_i32_0 = arith.constant 0 : i32
    %c0_i32_1 = arith.constant 0 : i32
    %c0_i32_2 = arith.constant 0 : i32
    return %c0_i32, %c0_i32_0, %c0_i32_1 : i32, i32, i32
  }
  func.func @transform_18(%arg0: i32) -> (i32, i32, i32) {
    %c0_i32 = arith.constant 0 : i32
    %c0_i32_0 = arith.constant 0 : i32
    %c0_i32_1 = arith.constant 0 : i32
    %c0_i32_2 = arith.constant 0 : i32
    return %c0_i32, %c0_i32_0, %c0_i32_1 : i32, i32, i32
  }
  func.func @transform_19(%arg0: i32) -> (i32, i32) {
    %c0_i32 = arith.constant 0 : i32
    %c0_i32_0 = arith.constant 0 : i32
    %c0_i32_1 = arith.constant 0 : i32
    return %c0_i32, %c0_i32_0 : i32, i32
  }
  func.func @transform_20(%arg0: i32) -> (i32, i32) {
    %c0_i32 = arith.constant 0 : i32
    %c0_i32_0 = arith.constant 0 : i32
    %c0_i32_1 = arith.constant 0 : i32
    return %c0_i32, %c0_i32_0 : i32, i32
  }
  func.func @transform_21(%arg0: i32) -> (i32, i32) {
    %c0_i32 = arith.constant 0 : i32
    %c0_i32_0 = arith.constant 0 : i32
    %c0_i32_1 = arith.constant 0 : i32
    return %c0_i32, %c0_i32_0 : i32, i32
  }
  func.func @transform_22(%arg0: i32) -> (i32, i32, i32) {
    %c0_i32 = arith.constant 0 : i32
    %c0_i32_0 = arith.constant 0 : i32
    %c0_i32_1 = arith.constant 0 : i32
    return %arg0, %c0_i32, %c0_i32_0 : i32, i32, i32
  }
}

</mosaic_0001>

<bundles_post_ra>
// kernel: tpu_custom_call.1
= control target key start
LH: loop header
LB: loop body
LE: loop exit
PB: predicated region body
PF: predicated region fallthrough
CT: control target
= control target key end

     0   :  { %s6471_s0 = inlined_call_operand.vmem [shape: s32[2,8,1], index: 0, kind: input, shape index: {}]   ;;  %s6472_s1 = inlined_call_operand.vmem [shape: f32[256,32], index: 1, kind: input, shape index: {}]   ;;  %s6473_s2 = inlined_call_operand.vmem [shape: f32[8,32], index: 2, kind: input, shape index: {}]   ;;  %s6474_s3 = inlined_call_operand.vmem [shape: f32[2,1,32], index: 3, kind: input, shape index: {}]   ;;  %s6475_s4 = inlined_call_operand.vmem [shape: f32[2,1,32], index: 4, kind: input, shape index: {}]   ;;  %s6476_s5 = inlined_call_operand.vmem [shape: bf16[2,4,32,8], index: 5, kind: input, shape index: {}]   ;;  %s6477_s6 = inlined_call_operand.vmem [shape: f32[2,4,1,8], index: 6, kind: input, shape index: {}]   ;;  %s6478_s7 = inlined_call_operand.vmem [shape: bf16[2,4,32,8], index: 7, kind: input, shape index: {}]   ;;  %s6479_s8 = inlined_call_operand.vmem [shape: f32[2,4,1,8], index: 8, kind: input, shape index: {}]   ;;  %s6480_s9 = inlined_call_operand.vmem [shape: bf16[2,4,32,8], index: 9, kind: input, shape index: {}]   ;;  %s6481_s10 = inlined_call_operand.vmem [shape: f32[2,4,1,8], index: 10, kind: input, shape index: {}]   ;;  %s6482_s11 = inlined_call_operand.vmem [shape: bf16[2,4,8,32], index: 11, kind: input, shape index: {}]   ;;  %s6483_s12 = inlined_call_operand.vmem [shape: f32[2,1,32], index: 12, kind: input, shape index: {}]   ;;  %s6484_s13 = inlined_call_operand.vmem [shape: f32[2,1,32], index: 13, kind: input, shape index: {}]   ;;  %s6485_s14 = inlined_call_operand.vmem [shape: f32[2,1,32], index: 14, kind: input, shape index: {}]   ;;  %s6486_s15 = inlined_call_operand.vmem [shape: bf16[2,32,128], index: 15, kind: input, shape index: {}]   ;;  %s6487_s16 = inlined_call_operand.vmem [shape: f32[2,1,128], index: 16, kind: input, shape index: {}]   ;;  %s6488_s17 = inlined_call_operand.vmem [shape: bf16[2,128,32], index: 17, kind: input, shape index: {}]   ;;  %s6489_s18 = inlined_call_operand.vmem [shape: f32[2,1,32], index: 18, kind: input, shape index: {}]   ;;  %s6490_s19 = inlined_call_operand.vmem [shape: f32[1,32], index: 19, kind: input, shape index: {}]   ;;  %s6491_s20 = inlined_call_operand.vmem [shape: f32[1,32], index: 20, kind: input, shape index: {}]   ;;  %s6492_s21 = inlined_call_operand.vmem [shape: bf16[32,256], index: 21, kind: input, shape index: {}]   ;;  %s6493_s22 = inlined_call_operand.hbm [shape: f32[2,8,256], index: 22, kind: output, shape index: {}]  }
   0x1   :  { %6509 = sst [smem:[#allocation12_spill]] %s6471_s0 }
   0x2   :  { %6510 = sst [smem:[#allocation13_spill]] %s6472_s1 }
   0x3   :  { %6511 = sst [smem:[#allocation14_spill]] %s6473_s2 }
   0x4   :  { %6512 = sst [smem:[#allocation15_spill]] %s6474_s3 }
   0x5   :  { %6513 = sst [smem:[#allocation16_spill]] %s6475_s4 }
   0x6   :  { %6514 = sst [smem:[#allocation17_spill]] %s6476_s5 }
   0x7   :  { %6515 = sst [smem:[#allocation18_spill]] %s6477_s6 }
   0x8   :  { %6516 = sst [smem:[#allocation19_spill]] %s6478_s7 }
   0x9   :  { %6517 = sst [smem:[#allocation20_spill]] %s6479_s8 }
   0xa   :  { %6518 = sst [smem:[#allocation21_spill]] %s6493_s22 }
   0xb   :  { %27 = vsyncpa [#allocation3], 0 }
   0xc   :  { %29 = vsyncpa [#allocation3 + $0x1], 0  ;;  %s5518_s3 = smov 0   ;;  %s5520_s28 = smov 0  }
   0xd   :  { %s5522_s29 = smov 0   ;;  %s5524_s30 = smov 0  }
   0xe LB: > { %6519 = sst [smem:[#allocation5_spill]] %s5384_s3  ;;  %s5539_s4 = sadd.s32 4294967295, %s5396_s30   ;;  %s5396_s30 = sphi %s5524_s30, %s6544_s30   ;;  %s5392_s29 = sphi %s5522_s29, %s6546_s29   ;;  %s5388_s28 = sphi %s5520_s28, %s6548_s28   ;;  %s5384_s3 = sphi %s5518_s3, %s6547_s3  }
   0xf   : > { %6520 = sst [smem:[#allocation6_spill]] %s5392_s29  ;;  %s4297_s0 = sadd.s32 4294967294, %s5396_s30  }
  0x10   : > { %6521 = sst [smem:[#allocation7_spill]] %s5396_s30  ;;  %s5543_s23 = sadd.s32 1, %s5396_s30  }
  0x11   : > { %6522 = sst [smem:[#allocation8_spill]] %s5543_s23  ;;  %s509_s1 = sadd.s32 1, %s5392_s29 }
  0x12   : > { %s506_s5 = ssub.s32 %s5396_s30, %s5543_s23  ;;  %p519_p0 = scmp.ne.s32.totalorder %s5392_s29, %s5388_s28 }
  0x13   : > { %p507_p1 = scmp.eq.s32.totalorder %s506_s5, 0  ;;  %p520_p2 = scmp.eq.s32.totalorder %s5539_s4, 1 }
  0x14   : > { %p525_p3 = scmp.ne.s32.totalorder %s5388_s28, %s5384_s3  ;;  %p526_p4 = scmp.eq.s32.totalorder %s4297_s0, 1 }
  0x15   : > { %s5554_s24 = scalar_select %p507_p1, %s5392_s29, %s509_s1  }
  0x16   : > { %p5556_p5 = por %p520_p2, %p519_p0  ;;  %p5560_p6 = por %p526_p4, %p525_p3 }
  0x17   : > { %6523 = sst [smem:[#allocation9_spill]] %s5554_s24  ;;  %p4300_p7 = scmp.ge.s32.totalorder %s5396_s30, 1 }
  0x18   : > { %s6524_s6 = scalar_select %p5556_p5, 1, 0 }
  0x19   : > { %s6526_s25 = scalar_select %p5560_p6, 1, 0 }
  0x1a   : > { %6525 = sst [smem:[#allocation10_spill]] %s6524_s6  ;;  %p614_p8 = scmp.lt.s32.totalorder %s5396_s30, 3 }
  0x1b   : > { %6527 = sst [smem:[#allocation11_spill]] %s6526_s25 }
  0x1c   : > { %p615_p9 = pnand %p4300_p7, %p614_p8 }
  0x1d   : > { %p675_p10 = scmp.lt.s32.totalorder (!%p615_p9), %s5539_s4, 1  ;;  %s6528_s27 = sld [smem:[#allocation13_spill]] (!%p615_p9)  ;;  %v5398_v3 = vmov (!%p615_p9), 0   ;;  %v681_v50 = vlaneseq (!%p615_p9)  ;;  %v5399_v54 = vmov (!%p615_p9), 1.0   ;;  %vm801_vm2 = vcmask (!%p615_p9), 261120  }
  0x1e   : > { %618 = sbr.rel (%p615_p9) target bundleno = 5570 (0x15c2), region = 108  ;;  %5213 = vset.pattern.permute.xlu0 (!%p615_p9), %v5398_v3  ;;  %s6529_s24 = sld [smem:[#allocation12_spill]] (!%p615_p9)  ;;  %vm5401_vm3 = vmmov (!%p615_p9), 0   ;;  %vm1598_vm4 = vcmask (!%p615_p9), 64512   ;;  %vm1848_vm5 = vcmask (!%p615_p9), 1043456  }
  0x1f   : > { %v5669_v51 = vand.u32 (!%p615_p9), 127, %v681_v50  ;;  %s6531_s2 = sld [smem:[#allocation17_spill]] (!%p615_p9)  ;;  %s6532_s7 = sld [smem:[#allocation19_spill]] (!%p615_p9) }
  0x20   : > { %s6533_s25 = sld [smem:[#allocation15_spill]] (!%p615_p9)  ;;  %s6535_s8 = sld [smem:[#allocation20_spill]] (!%p615_p9) }
  0x21   : > { %v683_v52 = vadd.s32 (!%p615_p9), 128, %v5669_v51  ;;  %s6536_s23 = sld [smem:[#allocation18_spill]] (!%p615_p9)  ;;  %s672_s22 = sand.u32 (!%p615_p9), 1, %s5388_s28  }
  0x23   : > { %v709_v0 = vld [vmem:[%s6528_s27 + $0x80] sm:$0xff] (!%p615_p9)  ;;  %v710_v1 = vld [vmem:[%s6528_s27 + $0x88] sm:$0xff] (!%p615_p9)  ;;  %v711_v6 = vld [vmem:[%s6528_s27 + $0x90] sm:$0xff] (!%p615_p9) }
  0x24   : > { %v693_v2 = vld [vmem:[%s6528_s27] sm:$0xff] (!%p615_p9)  ;;  %v5138_v4 = vpack.c.bf16 (!%p615_p9), %v710_v1, %v709_v0  ;;  %v694_v5 = vld [vmem:[%s6528_s27 + $0x8] sm:$0xff] (!%p615_p9)  ;;  %v712_v7 = vld [vmem:[%s6528_s27 + $0x98] sm:$0xff] (!%p615_p9) }
  0x25   : > { %s676_s0 = scalar_select %p675_p10, %s5539_s4, 1  ;;  %v5140_v8 = vpack.c.bf16 %v694_v5, %v693_v2  ;;  %v5142_v9 = vpack.c.bf16 %v712_v7, %v711_v6  ;;  %v695_v10 = vld [vmem:[%s6528_s27 + $0x10] sm:$0xff]  ;;  %v696_v11 = vld [vmem:[%s6528_s27 + $0x18] sm:$0xff]  ;;  %v713_v12 = vld [vmem:[%s6528_s27 + $0xa0] sm:$0xff]  ;;  %v5400_v5 = vmov 0.0  }
  0x26   : > { %5139 = vmatprep.subr.bf16.mxu0 %v5138_v4  ;;  %v714_v13 = vld [vmem:[%s6528_s27 + $0xa8] sm:$0xff]  ;;  %v5144_v14 = vpack.c.bf16 %v696_v11, %v695_v10  ;;  %v697_v16 = vld [vmem:[%s6528_s27 + $0x20] sm:$0xff]  ;;  %v715_v19 = vld [vmem:[%s6528_s27 + $0xb0] sm:$0xff]  ;;  %4746 = vmatprep.subr.bf16.mxu1 %v5400_v5 }
  0x27   : > { %s4302_s26 = sshll.u32 %s676_s0, 3  ;;  %5141 = vmatpush3.bf16.msra.mxu0 %v5140_v8  ;;  %v5146_v15 = vpack.c.bf16 %v714_v13, %v713_v12  ;;  %v698_v17 = vld [vmem:[%s6528_s27 + $0x28] sm:$0xff]  ;;  %v716_v20 = vld [vmem:[%s6528_s27 + $0xb8] sm:$0xff]  ;;  %v699_v23 = vld [vmem:[%s6528_s27 + $0x30] sm:$0xff]  ;;  %s6530_s0 = sld [smem:[#allocation14_spill]]  ;;  %4750 = vmatprep.mubr.msk.bf16.mxu1 %vm5401_vm3, %v5400_v5 }
  0x28   : > { %s678_s1 = scalar_lea.vmem %s6529_s24, %s4302_s26  ;;  %5143 = vmatprep.subr.bf16.mxu0 %v5142_v9  ;;  %v5148_v21 = vpack.c.bf16 %v698_v17, %v697_v16  ;;  %v5150_v22 = vpack.c.bf16 %v716_v20, %v715_v19  ;;  %v700_v24 = vld [vmem:[%s6528_s27 + $0x38] sm:$0xff]  ;;  %v717_v25 = vld [vmem:[%s6528_s27 + $0xc0] sm:$0xff]  ;;  %v718_v26 = vld [vmem:[%s6528_s27 + $0xc8] sm:$0xff]  ;;  %s6534_s26 = sld [smem:[#allocation16_spill]] }
  0x29   : > { %v680_v18 = vld [vmem:[%s678_s1] sm:$0xff]  ;;  %v702_v28 = vld [vmem:[%s6528_s27 + $0x48] sm:$0xff]  ;;  %v5152_v29 = vpack.c.bf16 %v700_v24, %v699_v23  ;;  %v719_v30 = vld [vmem:[%s6528_s27 + $0xd0] sm:$0xff]  ;;  %v5154_v32 = vpack.c.bf16 %v718_v26, %v717_v25  ;;  %s4301_s1 = sshll.u32 %s672_s22, 4 }
  0x2a   : > { %685 = vperm.xlu0 %5213, %v680_v18   ;;  %v701_v27 = vld [vmem:[%s6528_s27 + $0x40] sm:$0xff]  ;;  %v720_v31 = vld [vmem:[%s6528_s27 + $0xd8] sm:$0xff]  ;;  %v703_v33 = vld [vmem:[%s6528_s27 + $0x50] sm:$0xff]  ;;  %s674_s30 = scalar_lea.vmem [#allocation2], %s4301_s1 }
  0x2b   : > { %5145 = vmatpush3.bf16.msra.mxu0 %v5144_v14  ;;  %v704_v34 = vld [vmem:[%s6528_s27 + $0x58] sm:$0xff]  ;;  %v5156_v35 = vpack.c.bf16 %v702_v28, %v701_v27  ;;  %v721_v36 = vld [vmem:[%s6528_s27 + $0xe0] sm:$0xff]  ;;  %v722_v37 = vld [vmem:[%s6528_s27 + $0xe8] sm:$0xff]  ;;  %v5158_v38 = vpack.c.bf16 %v720_v31, %v719_v30  ;;  %s4238_s5 = sshll.u32 %s674_s30, 4  ;;  %s6426_s5 = int_to_ptr.vmem [resolvable:$true] %s4238_s5 }
  0x2c   : > { %5147 = vmatprep.subr.bf16.mxu0 %v5146_v15  ;;  %v705_v39 = vld [vmem:[%s6528_s27 + $0x60] sm:$0xff]  ;;  %v706_v40 = vld [vmem:[%s6528_s27 + $0x68] sm:$0xff]  ;;  %v5160_v41 = vpack.c.bf16 %v704_v34, %v703_v33  ;;  %v723_v42 = vld [vmem:[%s6528_s27 + $0xf0] sm:$0xff]  ;;  %v5162_v44 = vpack.c.bf16 %v722_v37, %v721_v36  ;;  %s5334_s1 = scalar_lea.vmem %s6426_s5, 256 }
  0x2d   : > { %v724_v43 = vld [vmem:[%s6528_s27 + $0xf8] sm:$0xff]  ;;  %v707_v45 = vld [vmem:[%s6528_s27 + $0x70] sm:$0xff]  ;;  %v5164_v47 = vpack.c.bf16 %v706_v40, %v705_v39  ;;  %v725_v56 = vld [vmem:[%s6530_s0] sm:$0xff]  ;;  %s4224_s0 = scalar_lea.sflag [#allocation3], %s672_s22  ;;  %p5335_p11 = scmp.ne.s32.totalorder %s6426_s5, %s5334_s1 }
  0x2e   : > { %v708_v46 = vld [vmem:[%s6528_s27 + $0x78] sm:$0xff]  ;;  %v5166_v48 = vpack.c.bf16 %v724_v43, %v723_v42  ;;  %v5214_v2 = vld [vmem:[%s6531_s2] sm:$0xff]   ;;  %v5216_v6 = vld [vmem:[%s6531_s2 + $0x8] sm:$0xff]  }
  0x2f   : > { %5149 = vmatpush3.bf16.msra.mxu0 %v5148_v21  ;;  %v5168_v49 = vpack.c.bf16 %v708_v46, %v707_v45  ;;  %v5215_v4 = vld [vmem:[%s6532_s7 + $0x20] sm:$0xff]   ;;  %4747 = vmatpush3.bf16.msra.mxu1 %v5214_v2  ;;  %v5217_v7 = vld [vmem:[%s6532_s7 + $0x28] sm:$0xff]   ;;  %v5218_v17 = vld [vmem:[%s6531_s2 + $0x10] sm:$0xff]   ;;  %p5336_p12 = pnand %p5335_p11, %p5556_p5 }
  0x30   : > { %5151 = vmatprep.subr.bf16.mxu0 %v5150_v22  ;;  %4748 = vmatprep.subr.bf16.mxu1 %v5400_v5  ;;  %v4307_v12 = vld [vmem:[%s6533_s25] ss:$0 sm:$0xff]  ;;  %v5220_v20 = vld [vmem:[%s6531_s2 + $0x18] sm:$0xff]   ;;  %v5221_v21 = vld [vmem:[%s6480_s9 + $0x8] sm:$0xff]  }
  0x31   : > { %v4308_v14 = vld [vmem:[%s6534_s26] ss:$0 sm:$0xff]  ;;  %v5224_v24 = vld [vmem:[%s6531_s2 + $0x28] sm:$0xff]   ;;  %v5226_v26 = vld [vmem:[%s6531_s2 + $0x30] sm:$0xff]   ;;  %p5337_p13 = pneg %p5336_p12 }
  0x32   : > { %v5219_v18 = vld [vmem:[%s6480_s9] sm:$0xff]   ;;  %v5225_v25 = vld [vmem:[%s6480_s9 + $0x28] sm:$0xff]   ;;  %v5227_v27 = vld [vmem:[%s6531_s2 + $0x38] sm:$0xff]  }
  0x33   : > { %5153 = vmatpush3.bf16.msra.mxu0 %v5152_v29  ;;  %4749 = vmatpush3.bf16.msra.mxu1 %v5216_v6  ;;  %v5222_v22 = vld [vmem:[%s6531_s2 + $0x20] sm:$0xff]   ;;  %v5229_v29 = vld [vmem:[%s6532_s7 + $0x8] sm:$0xff]   ;;  %v5230_v30 = vld [vmem:[%s6532_s7 + $0x10] sm:$0xff]  }
  0x34   : > { %5155 = vmatprep.subr.bf16.mxu0 %v5154_v32  ;;  %4754 = vmatprep.subr.bf16.mxu1 %v5400_v5  ;;  %v5223_v23 = vld [vmem:[%s6480_s9 + $0x20] sm:$0xff]   ;;  %v5231_v31 = vld [vmem:[%s6532_s7 + $0x18] sm:$0xff]   ;;  %v5232_v32 = vld [vmem:[%s6532_s7 + $0x30] sm:$0xff]  }
  0x35   : > { %v5228_v28 = vld [vmem:[%s6532_s7] sm:$0xff]   ;;  %v5233_v33 = vld [vmem:[%s6532_s7 + $0x38] sm:$0xff]   ;;  %v5234_v34 = vld [vmem:[%s6480_s9 + $0x10] sm:$0xff]  }
  0x36   : > { %v5236_v36 = vld [vmem:[%s6480_s9 + $0x30] sm:$0xff]   ;;  %v5237_v37 = vld [vmem:[%s6480_s9 + $0x38] sm:$0xff]  }
  0x37   : > { %5157 = vmatpush3.bf16.msra.mxu0 %v5156_v35  ;;  %v5235_v35 = vld [vmem:[%s6480_s9 + $0x18] sm:$0xff]  }
  0x38   : > { %5159 = vmatprep.subr.bf16.mxu0 %v5158_v38 }
  0x3b   : > { %5161 = vmatpush3.bf16.msra.mxu0 %v5160_v41 }
  0x3c   : > { %5163 = vmatprep.subr.bf16.mxu0 %v5162_v44 }
  0x3f   : > { %5165 = vmatpush3.bf16.msra.mxu0 %v5164_v47 }
  0x40   : > { %5167 = vmatprep.subr.bf16.mxu0 %v5166_v48 }
  0x43   : > { %5169 = vmatpush3.bf16.msra.mxu0 %v5168_v49 }
  0x44   : > { %4794 = vmatprep.subr.bf16.mxu0 %v5400_v5 }
  0xa9   : > { %v686_v53 = vpop.permute.xlu0 %685 }
  0xaa   : > { %vm687_vm0 = vcmp.eq.s32.totalorder %v5669_v51, %v686_v53  ;;  %vm688_vm1 = vcmp.eq.s32.totalorder %v683_v52, %v686_v53 }
  0xab   : > { %4305 = vmatprep.mubr.msk.f32.mxu0 %vm688_vm1, %v5399_v54 }
  0xac   : > { %4306 = vmatmul.mubr.msk.f32.vlgmr.msra.gmra.mrb[0].mxu0 %vm687_vm0, %v5399_v54 }
  0xad   : > { %4795 = vmatpush3.bf16.msra.mxu0 %v5215_v4  ;;  %4798 = vmatprep.mubr.msk.bf16.mxu0 %vm5401_vm3, %v5400_v5 }
  0xae   : > { %4796 = vmatprep.subr.bf16.mxu0 %v5400_v5 }
  0xb1   : > { %4797 = vmatpush3.bf16.msra.mxu0 %v5217_v7  ;;  %v4325_v7 = vld [vmem:[%s6535_s8] ss:$0 sm:$0xff] }
  0xb2   : > { %4810 = vmatprep.subr.bf16.mxu0 %v5400_v5 }
 0x17f   : > { %v4599_v55 = vpop.f32.mrb[0].mxu0 }
 0x180   : > { %v4600_v57 = vpop.f32.mrb[1].mxu0 }
 0x181   : > { %v4601_v58 = vadd.f32 %v4600_v57, %v4599_v55 }
 0x183   : > { %v5676_v59 = vadd.f32 %v4601_v58, %v725_v56 }
 0x185   : > { %v802_v60 = vsel %vm801_vm2, %v5676_v59, 0.0 }
 0x186   : > { %803 = vadd.xlane.f32.xlu0 %v802_v60 }
 0x213   : > { %v804_v61 = vpop.xlane.xlu0 %803 }
 0x214   : > { %v806_v62 = vmul.f32 0.03125, %v804_v61 }
 0x216   : > { %v807_v63 = vsub.f32 %v5676_v59, %v806_v62 }
 0x218   : > { %v808_v0 = vmul.f32 %v807_v63, %v807_v63 }
 0x21a   : > { %v809_v1 = vsel %vm801_vm2, %v808_v0, 0.0 }
 0x21b   : > { %810 = vadd.xlane.f32.xlu1 %v809_v1 }
 0x2a8   : > { %v811_v8 = vpop.xlane.xlu1 %810 }
 0x2a9   : > { %v812_v9 = vmul.f32 0.03125, %v811_v8 }
 0x2ab   : > { %v813_v10 = vadd.f32 1e-05, %v812_v9 }
 0x2ad   : > { %5288 = vrsqrt.f32 %v813_v10 }
 0x2b7   : > { %v5289_v11 = vpop.eup %5288 }
 0x2b8   : > { %v815_v13 = vmul.f32 %v5289_v11, %v807_v63  ;;  %v4327_v11 = vld [vmem:[%s6535_s8 + $0x2] ss:$0 sm:$0xff] }
 0x2ba   : > { %v822_v15 = vmul.f32 %v4307_v12, %v815_v13 }
 0x2bc   : > { %v829_v16 = vadd.f32 %v4308_v14, %v822_v15  ;;  %v4309_v15 = vld [vmem:[%s6536_s23] ss:$0 sm:$0xff] }
 0x2be   : > { %v5716_v19 = vpack.c.bf16 %v829_v16, %v829_v16 }
 0x2c0   : > { %4751 = vmatmul.mubr.msk.bf16.vlgmr.msra.gmra.mrb[0].mxu1 %vm801_vm2, %v5716_v19  ;;  %4799 = vmatmul.mubr.msk.bf16.vlgmr.msra.gmra.mrb[4].mxu0 %vm801_vm2, %v5716_v19 }
 0x2c1   : > { %4755 = vmatpush3.bf16.msra.mxu1 %v5218_v17  ;;  %4811 = vmatpush3.bf16.msra.mxu0 %v5219_v18  ;;  %v4326_v18 = vld [vmem:[%s6535_s8 + $0x1] ss:$0 sm:$0xff] }
 0x2c2   : > { %4756 = vmatprep.subr.bf16.mxu1 %v5400_v5  ;;  %4812 = vmatprep.subr.bf16.mxu0 %v5400_v5 }
 0x2c3   : > { %4758 = vmatprep.mubr.msk.bf16.mxu1 %vm5401_vm3, %v5400_v5  ;;  %4814 = vmatprep.mubr.msk.bf16.mxu0 %vm5401_vm3, %v5400_v5 }
 0x2c5   : > { %4757 = vmatpush3.bf16.msra.mxu1 %v5220_v20  ;;  %4813 = vmatpush3.bf16.msra.mxu0 %v5221_v21 }
 0x2c6   : > { %4762 = vmatprep.subr.bf16.mxu1 %v5400_v5  ;;  %4826 = vmatprep.subr.bf16.mxu0 %v5400_v5 }
 0x2c8   : > { %4759 = vmatmul.mubr.msk.bf16.vlgmr.msra.gmra.mrb[4].mxu1 %vm801_vm2, %v5716_v19  ;;  %4815 = vmatmul.mubr.msk.bf16.vlgmr.msra.gmra.mrb[8].mxu0 %vm801_vm2, %v5716_v19 }
 0x2c9   : > { %4763 = vmatpush3.bf16.msra.mxu1 %v5222_v22  ;;  %4827 = vmatpush3.bf16.msra.mxu0 %v5223_v23 }
 0x2ca   : > { %4764 = vmatprep.subr.bf16.mxu1 %v5400_v5  ;;  %4828 = vmatprep.subr.bf16.mxu0 %v5400_v5 }
 0x2cb   : > { %4766 = vmatprep.mubr.msk.bf16.mxu1 %vm5401_vm3, %v5400_v5  ;;  %4830 = vmatprep.mubr.msk.bf16.mxu0 %vm5401_vm3, %v5400_v5 }
 0x2cd   : > { %4765 = vmatpush3.bf16.msra.mxu1 %v5224_v24  ;;  %4829 = vmatpush3.bf16.msra.mxu0 %v5225_v25  ;;  %v4341_v24 = vld [vmem:[%s6481_s10] ss:$0 sm:$0xff] }
 0x2ce   : > { %4770 = vmatprep.subr.bf16.mxu1 %v5400_v5  ;;  %4842 = vmatprep.subr.bf16.mxu0 %v5400_v5 }
 0x2d0   : > { %4767 = vmatmul.mubr.msk.bf16.vlgmr.msra.gmra.mrb[8].mxu1 %vm801_vm2, %v5716_v19  ;;  %4831 = vmatmul.mubr.msk.bf16.vlgmr.msra.gmra.mrb[12].mxu0 %vm801_vm2, %v5716_v19 }
 0x2d1   : > { %4771 = vmatpush3.bf16.msra.mxu1 %v5226_v26  ;;  %4774 = vmatprep.mubr.msk.bf16.mxu1 %vm5401_vm3, %v5400_v5 }
 0x2d2   : > { %4772 = vmatprep.subr.bf16.mxu1 %v5400_v5  ;;  %4844 = vmatprep.mubr.msk.bf16.mxu0 %vm5401_vm3, %v5400_v5 }
 0x2d5   : > { %4773 = vmatpush3.bf16.msra.mxu1 %v5227_v27 }
 0x2d6   : > { %4778 = vmatprep.subr.bf16.mxu1 %v5400_v5 }
 0x2d8   : > { %4775 = vmatmul.mubr.msk.bf16.vlgmr.msra.gmra.mrb[12].mxu1 %vm801_vm2, %v5716_v19 }
 0x2d9   : > { %4779 = vmatpush3.bf16.msra.mxu1 %v5228_v28  ;;  %4782 = vmatprep.mubr.msk.bf16.mxu1 %vm5401_vm3, %v5400_v5 }
 0x2da   : > { %4780 = vmatprep.subr.bf16.mxu1 %v5400_v5 }
 0x2dd   : > { %4781 = vmatpush3.bf16.msra.mxu1 %v5229_v29  ;;  %v4310_v29 = vld [vmem:[%s6536_s23 + $0x1] ss:$0 sm:$0xff] }
 0x2de   : > { %4786 = vmatprep.subr.bf16.mxu1 %v5400_v5 }
 0x2e0   : > { %4783 = vmatmul.mubr.msk.bf16.vlgmr.msra.gmra.mrb[16].mxu1 %vm801_vm2, %v5716_v19 }
 0x2e1   : > { %4787 = vmatpush3.bf16.msra.mxu1 %v5230_v30  ;;  %4790 = vmatprep.mubr.msk.bf16.mxu1 %vm5401_vm3, %v5400_v5  ;;  %v4311_v30 = vld [vmem:[%s6536_s23 + $0x2] ss:$0 sm:$0xff] }
 0x2e2   : > { %4788 = vmatprep.subr.bf16.mxu1 %v5400_v5 }
 0x2e5   : > { %4789 = vmatpush3.bf16.msra.mxu1 %v5231_v31 }
 0x2e6   : > { %4802 = vmatprep.subr.bf16.mxu1 %v5400_v5 }
 0x2e8   : > { %4791 = vmatmul.mubr.msk.bf16.vlgmr.msra.gmra.mrb[20].mxu1 %vm801_vm2, %v5716_v19 }
 0x2e9   : > { %4803 = vmatpush3.bf16.msra.mxu1 %v5232_v32  ;;  %4806 = vmatprep.mubr.msk.bf16.mxu1 %vm5401_vm3, %v5400_v5 }
 0x2ea   : > { %4804 = vmatprep.subr.bf16.mxu1 %v5400_v5 }
 0x2ed   : > { %4805 = vmatpush3.bf16.msra.mxu1 %v5233_v33 }
 0x2ee   : > { %4818 = vmatprep.subr.bf16.mxu1 %v5400_v5 }
 0x2f0   : > { %4807 = vmatmul.mubr.msk.bf16.vlgmr.msra.gmra.mrb[24].mxu1 %vm801_vm2, %v5716_v19 }
 0x2f1   : > { %4819 = vmatpush3.bf16.msra.mxu1 %v5234_v34  ;;  %4822 = vmatprep.mubr.msk.bf16.mxu1 %vm5401_vm3, %v5400_v5  ;;  %v4328_v34 = vld [vmem:[%s6535_s8 + $0x3] ss:$0 sm:$0xff] }
 0x2f2   : > { %4820 = vmatprep.subr.bf16.mxu1 %v5400_v5 }
 0x2f5   : > { %4821 = vmatpush3.bf16.msra.mxu1 %v5235_v35 }
 0x2f6   : > { %4834 = vmatprep.subr.bf16.mxu1 %v5400_v5 }
 0x2f8   : > { %4823 = vmatmul.mubr.msk.bf16.vlgmr.msra.gmra.mrb[28].mxu1 %vm801_vm2, %v5716_v19 }
 0x2f9   : > { %4835 = vmatpush3.bf16.msra.mxu1 %v5236_v36  ;;  %4838 = vmatprep.mubr.msk.bf16.mxu1 %vm5401_vm3, %v5400_v5 }
 0x2fa   : > { %4836 = vmatprep.subr.bf16.mxu1 %v5400_v5 }
 0x2fd   : > { %4837 = vmatpush3.bf16.msra.mxu1 %v5237_v37 }
 0x2fe   : > { %4848 = vmatprep.subr.bf16.mxu1 %v5400_v5 }
 0x300   : > { %4839 = vmatmul.mubr.msk.bf16.vlgmr.msra.gmra.mrb[32].mxu1 %vm801_vm2, %v5716_v19 }
 0x301   : > { %4850 = vmatprep.mubr.msk.bf16.mxu1 %vm5401_vm3, %v5400_v5 }
 0x393   : > { %v924_v38 = vpop.f32.mrb[0].mxu1  ;;  %v1280_v39 = vpop.f32.mrb[4].mxu0 }
 0x394   : > { %v4752_v40 = vpop.f32.mrb[1].mxu1  ;;  %v4800_v41 = vpop.f32.mrb[5].mxu0  ;;  %v1281_v16 = vadd.f32 %v4327_v11, %v1280_v39  ;;  %v925_v19 = vadd.f32 %v4309_v15, %v924_v38 }
 0x395   : > { %v927_v42 = vpop.f32.mrb[2].mxu1  ;;  %v1283_v43 = vpop.f32.mrb[6].mxu0 }
 0x396   : > { %v4753_v44 = vpop.f32.mrb[3].mxu1  ;;  %v4801_v45 = vpop.f32.mrb[7].mxu0  ;;  %v1596_v21 = vpack.c.bf16 %v1281_v16, %v1281_v16  ;;  %v1590_v26 = vpack.c.bf16 %v925_v19, %v925_v19 }
 0x398   : > { %v1695_v31 = vsel %vm1598_vm4, %v1596_v21, 0 }
 0x39b   : > { %v976_v46 = vpop.f32.mrb[4].mxu1  ;;  %v1428_v47 = vpop.f32.mrb[8].mxu0 }
 0x39c   : > { %v4760_v48 = vpop.f32.mrb[5].mxu1  ;;  %v4816_v49 = vpop.f32.mrb[9].mxu0  ;;  %v1429_v32 = vadd.f32 %v4341_v24, %v1428_v47  ;;  %v977_v35 = vadd.f32 %v4310_v29, %v976_v46  ;;  %v4312_v46 = vld [vmem:[%s6536_s23 + $0x3] ss:$0 sm:$0xff] }
 0x39d   : > { %v979_v52 = vpop.f32.mrb[6].mxu1  ;;  %v1431_v53 = vpop.f32.mrb[10].mxu0  ;;  %v4342_v49 = vld [vmem:[%s6481_s10 + $0x1] ss:$0 sm:$0xff] }
 0x39e   : > { %v4761_v54 = vpop.f32.mrb[7].mxu1  ;;  %v4817_v55 = vpop.f32.mrb[11].mxu0  ;;  %v1841_v38 = vpack.c.bf16 %v1429_v32, %v1429_v32  ;;  %v1591_v42 = vpack.c.bf16 %v977_v35, %v977_v35 }
 0x3a0   : > { %v1850_v47 = vsel %vm1848_vm5, %v1841_v38, 0 }
 0x3a3   : > { %v1028_v56 = vpop.f32.mrb[8].mxu1  ;;  %v5840_v57 = vpop.f32.mrb[12].mxu0 }
 0x3a4   : > { %v4768_v58 = vpop.f32.mrb[9].mxu1  ;;  %v4832_v60 = vpop.f32.mrb[13].mxu0  ;;  %v1029_v36 = vadd.f32 %v4311_v30, %v1028_v56 }
 0x3a5   : > { %v1031_v61 = vpop.f32.mrb[10].mxu1  ;;  %v1535_v62 = vpop.f32.mrb[14].mxu0 }
 0x3a6   : > { %v4769_v63 = vpop.f32.mrb[11].mxu1  ;;  %v4833_v0 = vpop.f32.mrb[15].mxu0  ;;  %v1592_v43 = vpack.c.bf16 %v1029_v36, %v1029_v36 }
 0x3ab   : > { %v1080_v1 = vpop.f32.mrb[12].mxu1 }
 0x3ac   : > { %v4776_v2 = vpop.f32.mrb[13].mxu1  ;;  %v1081_v52 = vadd.f32 %v4312_v46, %v1080_v1 }
 0x3ad   : > { %v1083_v4 = vpop.f32.mrb[14].mxu1 }
 0x3ae   : > { %v4777_v6 = vpop.f32.mrb[15].mxu1  ;;  %v1593_v58 = vpack.c.bf16 %v1081_v52, %v1081_v52  ;;  %v797_v4 = vshrl.u32 %v681_v50, 7 }
 0x3b0   : > { %vm5900_vm6 = vcmp.ge.s32.totalorder %v797_v4, %v5669_v51 }
 0x3b3   : > { %v1176_v8 = vpop.f32.mrb[16].mxu1 }
 0x3b4   : > { %v1177_v9 = vadd.f32 %v4325_v7, %v1176_v8  ;;  %v4784_v10 = vpop.f32.mrb[17].mxu1 }
 0x3b5   : > { %v1179_v12 = vpop.f32.mrb[18].mxu1 }
 0x3b6   : > { %v1594_v13 = vpack.c.bf16 %v1177_v9, %v1177_v9  ;;  %v4785_v14 = vpop.f32.mrb[19].mxu1 }
 0x3b8   : > { %v1603_v17 = vsel %vm1598_vm4, %v1594_v13, 0 }
 0x3b9   : > { %4843 = vmatpush3.bf16.xpose.msra.mxu0 %v1603_v17 }
 0x3ba   : > { %4854 = vmatprep.subr.bf16.mxu0 %v5400_v5 }
 0x3bb   : > { %v1228_v20 = vpop.f32.mrb[20].mxu1 }
 0x3bc   : > { %v1229_v22 = vadd.f32 %v4326_v18, %v1228_v20  ;;  %v4792_v23 = vpop.f32.mrb[21].mxu1 }
 0x3bd   : > { %v1231_v25 = vpop.f32.mrb[22].mxu1 }
 0x3be   : > { %v1595_v27 = vpack.c.bf16 %v1229_v22, %v1229_v22  ;;  %v4793_v28 = vpop.f32.mrb[23].mxu1 }
 0x3c0   : > { %v1649_v33 = vsel %vm1598_vm4, %v1595_v27, 0  ;;  %4845 = vmatmul.mubr.msk.bf16.vlgmr.msra.gmra.mrb[16].mxu0 %vm1598_vm4, %v1590_v26 }
 0x3c1   : > { %4849 = vmatpush3.bf16.xpose.msra.mxu1 %v1649_v33  ;;  %4855 = vmatpush3.bf16.xpose.msra.mxu0 %v1695_v31 }
 0x3c2   : > { %4856 = vmatprep.mubr.msk.bf16.mxu0 %vm5401_vm3, %v5400_v5  ;;  %4860 = vmatprep.subr.bf16.mxu1 %v5400_v5 }
 0x3c3   : > { %v1332_v37 = vpop.f32.mrb[24].mxu1  ;;  %4866 = vmatprep.subr.bf16.mxu0 %v5400_v5 }
 0x3c4   : > { %v1333_v39 = vadd.f32 %v4328_v34, %v1332_v37  ;;  %v4808_v40 = vpop.f32.mrb[25].mxu1 }
 0x3c5   : > { %v1335_v41 = vpop.f32.mrb[26].mxu1 }
 0x3c6   : > { %v1597_v44 = vpack.c.bf16 %v1333_v39, %v1333_v39  ;;  %v4809_v45 = vpop.f32.mrb[27].mxu1 }
 0x3c8   : > { %v1741_v48 = vsel %vm1598_vm4, %v1597_v44, 0  ;;  %4851 = vmatmul.mubr.msk.bf16.vlgmr.msra.gmra.mrb[36].mxu1 %vm1598_vm4, %v1591_v42  ;;  %4857 = vmatmul.mubr.msk.bf16.vlgmr.msra.gmra.mrb[20].mxu0 %vm1598_vm4, %v1592_v43 }
 0x3c9   : > { %4861 = vmatpush3.bf16.xpose.msra.mxu1 %v1741_v48  ;;  %4867 = vmatpush3.bf16.msra.mxu0 %v1850_v47 }
 0x3ca   : > { %4862 = vmatprep.mubr.msk.bf16.mxu1 %vm5401_vm3, %v5400_v5  ;;  %4872 = vmatprep.subr.bf16.mxu1 %v5400_v5 }
 0x3cb   : > { %v1480_v53 = vpop.f32.mrb[28].mxu1  ;;  %4868 = vmatprep.mubr.msk.bf16.mxu0 %vm5401_vm3, %v5400_v5  ;;  %4878 = vmatprep.subr.bf16.mxu0 %v5400_v5 }
 0x3cc   : > { %v1481_v54 = vadd.f32 %v4342_v49, %v1480_v53  ;;  %v4824_v55 = vpop.f32.mrb[29].mxu1 }
 0x3cd   : > { %v1483_v56 = vpop.f32.mrb[30].mxu1 }
 0x3ce   : > { %v1842_v60 = vpack.c.bf16 %v1481_v54, %v1481_v54  ;;  %v4825_v61 = vpop.f32.mrb[31].mxu1  ;;  %v4343_v56 = vld [vmem:[%s6481_s10 + $0x2] ss:$0 sm:$0xff] }
 0x3d0   : > { %v1896_v62 = vsel %vm1848_vm5, %v1842_v60, 0  ;;  %4863 = vmatmul.mubr.msk.bf16.vlgmr.msra.gmra.mrb[40].mxu1 %vm1598_vm4, %v1593_v58  ;;  %v1533_v58 = vadd.f32 %v4343_v56, %v5840_v57 }
 0x3d1   : > { %4873 = vmatpush3.bf16.msra.mxu1 %v1896_v62  ;;  %4874 = vmatprep.mubr.msk.bf16.mxu1 %vm5401_vm3, %v5400_v5 }
 0x3d2   : > { %4884 = vmatprep.subr.bf16.mxu1 %v5400_v5  ;;  %v1843_v62 = vpack.c.bf16 %v1533_v58, %v1533_v58 }
 0x3d3   : > { %v5896_v63 = vpop.f32.mrb[32].mxu1 }
 0x3d4   : > { %v4840_v0 = vpop.f32.mrb[33].mxu1 }
 0x3d5   : > { %v1587_v1 = vpop.f32.mrb[34].mxu1 }
 0x3d6   : > { %v4841_v2 = vpop.f32.mrb[35].mxu1 }
 0x3d7   : > { %v4344_v2 = vld [vmem:[%s6481_s10 + $0x3] ss:$0 sm:$0xff] }
 0x493   : > { %v1639_v7 = vpop.f32.mrb[16].mxu0 }
 0x494   : > { %v1783_v8 = vmul.f32 0.35355338, %v1639_v7  ;;  %v4846_v9 = vpop.f32.mrb[17].mxu0  ;;  %v1942_v7 = vsel %vm1848_vm5, %v1843_v62, 0 }
 0x495   : > { %v1642_v10 = vpop.f32.mrb[18].mxu0 }
 0x496   : > { %v4847_v11 = vpop.f32.mrb[19].mxu0  ;;  %v1789_v12 = vsel %vm5900_vm6, %v1783_v8, -1e+30  ;;  %v1585_v8 = vadd.f32 %v4344_v2, %v5896_v63 }
 0x497   : > { %v1793_v13 = vsel %vm1598_vm4, %v1789_v12, -inf }
 0x498   : > { %1794 = vmax.xlane.f32.xlu1 %v1793_v13  ;;  %v1844_v10 = vpack.c.bf16 %v1585_v8, %v1585_v8 }
 0x49b   : > { %v1685_v14 = vpop.f32.mrb[36].mxu1  ;;  %v1731_v15 = vpop.f32.mrb[20].mxu0 }
 0x49c   : > { %v1784_v16 = vmul.f32 0.35355338, %v1685_v14  ;;  %v1785_v50 = vmul.f32 0.35355338, %v1731_v15  ;;  %v4852_v17 = vpop.f32.mrb[37].mxu1  ;;  %v4858_v51 = vpop.f32.mrb[21].mxu0 }
 0x49d   : > { %v1688_v18 = vpop.f32.mrb[38].mxu1  ;;  %v1734_v19 = vpop.f32.mrb[22].mxu0  ;;  %v1988_v14 = vsel %vm1848_vm5, %v1844_v10, 0  ;;  %v2034_v51 = vld [vmem:[%s6482_s11] sm:$0xf] }
 0x49e   : > { %v4853_v20 = vpop.f32.mrb[39].mxu1  ;;  %v4859_v21 = vpop.f32.mrb[23].mxu0  ;;  %v1790_v22 = vsel %vm5900_vm6, %v1784_v16, -1e+30  ;;  %v1791_v24 = vsel %vm5900_vm6, %v1785_v50, -1e+30 }
 0x49f   : > { %v1796_v23 = vsel %vm1598_vm4, %v1790_v22, -inf  ;;  %v1799_v26 = vsel %vm1598_vm4, %v1791_v24, -inf  ;;  %v2042_v18 = vsel %vm1848_vm5, %v2034_v51, 0  ;;  %v2035_v19 = vld [vmem:[%s6482_s11 + $0x4] sm:$0xf] }
 0x4a0   : > { %1797 = vmax.xlane.f32.xlu1 %v1796_v23  ;;  %v2088_v20 = vsel %vm1848_vm5, %v2035_v19, 0  ;;  %v2036_v21 = vld [vmem:[%s6482_s11 + $0x8] sm:$0xf]  ;;  %v5238_v51 = vld [vmem:[%s6486_s15] sm:$0xff]  }
 0x4a3   : > { %v1777_v25 = vpop.f32.mrb[40].mxu1 }
 0x4a4   : > { %v1786_v27 = vmul.f32 0.35355338, %v1777_v25  ;;  %1800 = vmax.xlane.f32.xlu1 %v1799_v26  ;;  %v4864_v28 = vpop.f32.mrb[41].mxu1  ;;  %v2134_v25 = vsel %vm1848_vm5, %v2036_v21, 0 }
 0x4a5   : > { %v1780_v29 = vpop.f32.mrb[42].mxu1  ;;  %v2037_v28 = vld [vmem:[%s6482_s11 + $0xc] sm:$0xf] }
 0x4a6   : > { %v4865_v30 = vpop.f32.mrb[43].mxu1  ;;  %v1792_v31 = vsel %vm5900_vm6, %v1786_v27, -1e+30 }
 0x4a7   : > { %v1802_v32 = vsel %vm1598_vm4, %v1792_v31, -inf }
 0x4a8   : > { %1803 = vmax.xlane.f32.xlu1 %v1802_v32  ;;  %v2180_v32 = vsel %vm1848_vm5, %v2037_v28, 0 }
 0x525   : > { %v1795_v33 = vpop.xlane.xlu1 %1794 }
 0x526   : > { %v1805_v34 = vsub.f32 %v1789_v12, %v1795_v33 }
 0x528   : > { %v1809_v35 = vmul.f32 1.442695, %v1805_v34 }
 0x52a   : > { %5290 = vpow2.f32 %v1809_v35 }
 0x52d   : > { %v1798_v36 = vpop.xlane.xlu1 %1797 }
 0x52e   : > { %v1806_v37 = vsub.f32 %v1790_v22, %v1798_v36 }
 0x530   : > { %v1811_v38 = vmul.f32 1.442695, %v1806_v37 }
 0x531   : > { %v1801_v39 = vpop.xlane.xlu1 %1800 }
 0x532   : > { %5292 = vpow2.f32 %v1811_v38  ;;  %v1807_v40 = vsub.f32 %v1791_v24, %v1801_v39 }
 0x534   : > { %v5291_v41 = vpop.eup %5290  ;;  %v1813_v42 = vmul.f32 1.442695, %v1807_v40 }
 0x535   : > { %v1804_v43 = vpop.xlane.xlu1 %1803  ;;  %v1817_v44 = vsel %vm1598_vm4, %v5291_v41, 0.0 }
 0x536   : > { %5294 = vpow2.f32 %v1813_v42  ;;  %v1808_v45 = vsub.f32 %v1792_v31, %v1804_v43  ;;  %1818 = vadd.xlane.f32.xlu1 %v1817_v44 }
 0x538   : > { %v1815_v46 = vmul.f32 1.442695, %v1808_v45 }
 0x53a   : > { %5296 = vpow2.f32 %v1815_v46 }
 0x53c   : > { %v5293_v47 = vpop.eup %5292 }
 0x53d   : > { %v1820_v48 = vsel %vm1598_vm4, %v5293_v47, 0.0 }
 0x53e   : > { %1821 = vadd.xlane.f32.xlu1 %v1820_v48 }
 0x540   : > { %v5295_v49 = vpop.eup %5294 }
 0x541   : > { %v1823_v52 = vsel %vm1598_vm4, %v5295_v49, 0.0 }
 0x542   : > { %1824 = vadd.xlane.f32.xlu1 %v1823_v52 }
 0x544   : > { %v5297_v53 = vpop.eup %5296 }
 0x545   : > { %v1826_v54 = vsel %vm1598_vm4, %v5297_v53, 0.0 }
 0x546   : > { %1827 = vadd.xlane.f32.xlu1 %v1826_v54 }
 0x5c3   : > { %v1819_v55 = vpop.xlane.xlu1 %1818 }
 0x5c4   : > { %5298 = vrcp.f32 %v1819_v55 }
 0x5cb   : > { %v1822_v60 = vpop.xlane.xlu1 %1821 }
 0x5cc   : > { %5300 = vrcp.f32 %v1822_v60 }
 0x5ce   : > { %v5299_v61 = vpop.eup %5298 }
 0x5cf   : > { %v1833_v0 = vmul.f32 %v5299_v61, %v5291_v41  ;;  %v1825_v1 = vpop.xlane.xlu1 %1824 }
 0x5d0   : > { %5302 = vrcp.f32 %v1825_v1 }
 0x5d1   : > { %v1837_v4 = vpack.c.bf16 %v1833_v0, %v1833_v0 }
 0x5d3   : > { %4869 = vmatmul.mubr.msk.bf16.vlgmr.msra.gmra.mrb[24].mxu0 %vm1598_vm4, %v1837_v4  ;;  %v1828_v9 = vpop.xlane.xlu1 %1827 }
 0x5d4   : > { %4879 = vmatpush3.bf16.msra.mxu0 %v1942_v7  ;;  %5304 = vrcp.f32 %v1828_v9  ;;  %4880 = vmatprep.mubr.msk.bf16.mxu0 %vm5401_vm3, %v5400_v5 }
 0x5d5   : > { %4890 = vmatprep.subr.bf16.mxu0 %v5400_v5 }
 0x5d6   : > { %v5301_v57 = vpop.eup %5300 }
 0x5d7   : > { %v1834_v11 = vmul.f32 %v5301_v57, %v5293_v47 }
 0x5d9   : > { %v1838_v12 = vpack.c.bf16 %v1834_v11, %v1834_v11  ;;  %v4369_v11 = vld [vmem:[%s6483_s12] ss:$0 sm:$0xff] }
 0x5da   : > { %v5303_v13 = vpop.eup %5302 }
 0x5db   : > { %v1835_v15 = vmul.f32 %v5303_v13, %v5295_v49  ;;  %4875 = vmatmul.mubr.msk.bf16.vlgmr.msra.gmra.mrb[44].mxu1 %vm1598_vm4, %v1838_v12 }
 0x5dc   : > { %4885 = vmatpush3.bf16.msra.mxu1 %v1988_v14  ;;  %4886 = vmatprep.mubr.msk.bf16.mxu1 %vm5401_vm3, %v5400_v5 }
 0x5dd   : > { %v1839_v63 = vpack.c.bf16 %v1835_v15, %v1835_v15  ;;  %4896 = vmatprep.subr.bf16.mxu1 %v5400_v5 }
 0x5de   : > { %v5305_v16 = vpop.eup %5304 }
 0x5df   : > { %v1836_v50 = vmul.f32 %v5305_v16, %v5297_v53  ;;  %4881 = vmatmul.mubr.msk.bf16.vlgmr.msra.gmra.mrb[28].mxu0 %vm1598_vm4, %v1839_v63 }
 0x5e0   : > { %4892 = vmatprep.mubr.msk.bf16.mxu0 %vm5401_vm3, %v5400_v5  ;;  %4891 = vmatpush3.bf16.msra.mxu0 %v2042_v18  ;;  %v5240_v18 = vld [vmem:[%s6488_s17] sm:$0xff]  }
 0x5e1   : > { %v1840_v17 = vpack.c.bf16 %v1836_v50, %v1836_v50  ;;  %4902 = vmatprep.subr.bf16.mxu0 %v5400_v5 }
 0x5e3   : > { %4887 = vmatmul.mubr.msk.bf16.vlgmr.msra.gmra.mrb[48].mxu1 %vm1598_vm4, %v1840_v17 }
 0x5e4   : > { %4898 = vmatprep.mubr.msk.bf16.mxu1 %vm5401_vm3, %v5400_v5  ;;  %4897 = vmatpush3.bf16.msra.mxu1 %v2088_v20 }
 0x5e5   : > { %4908 = vmatprep.subr.bf16.mxu1 %v5400_v5 }
 0x6a6   : > { %v1886_v22 = vpop.f32.mrb[24].mxu0 }
 0x6a7   : > { %v2030_v23 = vpack.c.bf16 %v1886_v22, %v1886_v22  ;;  %v4870_v24 = vpop.f32.mrb[25].mxu0 }
 0x6a8   : > { %v1889_v26 = vpop.f32.mrb[26].mxu0 }
 0x6a9   : > { %v4871_v27 = vpop.f32.mrb[27].mxu0  ;;  %4893 = vmatmul.mubr.msk.bf16.vlgmr.msra.gmra.mrb[32].mxu0 %vm1598_vm4, %v2030_v23  ;;  %v4370_v23 = vld [vmem:[%s6484_s13] ss:$0 sm:$0xff] }
 0x6aa   : > { %4903 = vmatpush3.bf16.msra.mxu0 %v2134_v25  ;;  %4904 = vmatprep.mubr.msk.bf16.mxu0 %vm5401_vm3, %v5400_v5  ;;  %v4371_v25 = vld [vmem:[%s6485_s14] ss:$0 sm:$0xff] }
 0x6ab   : > { %4914 = vmatprep.subr.bf16.mxu0 %v5400_v5 }
 0x6ae   : > { %v1932_v29 = vpop.f32.mrb[44].mxu1 }
 0x6af   : > { %v2031_v30 = vpack.c.bf16 %v1932_v29, %v1932_v29  ;;  %v4876_v31 = vpop.f32.mrb[45].mxu1  ;;  %v5241_v29 = vld [vmem:[%s6488_s17 + $0x8] sm:$0xff]  }
 0x6b0   : > { %v1935_v33 = vpop.f32.mrb[46].mxu1  ;;  %v5243_v31 = vld [vmem:[%s6488_s17 + $0x18] sm:$0xff]  }
 0x6b1   : > { %v4877_v34 = vpop.f32.mrb[47].mxu1  ;;  %4899 = vmatmul.mubr.msk.bf16.vlgmr.msra.gmra.mrb[52].mxu1 %vm1598_vm4, %v2031_v30  ;;  %v5242_v30 = vld [vmem:[%s6488_s17 + $0x10] sm:$0xff]   ;;  %v5245_v33 = vld [vmem:[%s6488_s17 + $0x28] sm:$0xff]  }
 0x6b2   : > { %v1978_v35 = vpop.f32.mrb[28].mxu0  ;;  %4909 = vmatpush3.bf16.msra.mxu1 %v2180_v32  ;;  %4910 = vmatprep.mubr.msk.bf16.mxu1 %vm5401_vm3, %v5400_v5  ;;  %v5244_v32 = vld [vmem:[%s6488_s17 + $0x20] sm:$0xff]   ;;  %v5246_v34 = vld [vmem:[%s6488_s17 + $0x30] sm:$0xff]  }
 0x6b3   : > { %v2032_v36 = vpack.c.bf16 %v1978_v35, %v1978_v35  ;;  %v4882_v37 = vpop.f32.mrb[29].mxu0  ;;  %4922 = vmatprep.subr.bf16.mxu1 %v5400_v5  ;;  %v5247_v35 = vld [vmem:[%s6488_s17 + $0x38] sm:$0xff]  }
 0x6b4   : > { %v1981_v38 = vpop.f32.mrb[30].mxu0 }
 0x6b5   : > { %v4883_v39 = vpop.f32.mrb[31].mxu0  ;;  %4905 = vmatmul.mubr.msk.bf16.vlgmr.msra.gmra.mrb[36].mxu0 %vm1598_vm4, %v2032_v36  ;;  %v4372_v36 = vld [vmem:[%s6487_s16] ss:$0 sm:$0xff] }
 0x6b6   : > { %v2024_v40 = vpop.f32.mrb[48].mxu1  ;;  %4918 = vmatprep.mubr.msk.bf16.mxu0 %vm5401_vm3, %v5400_v5  ;;  %4915 = vmatpush3.bf16.msra.mxu0 %v5238_v51 }
 0x6b7   : > { %v2033_v41 = vpack.c.bf16 %v2024_v40, %v2024_v40  ;;  %v4888_v42 = vpop.f32.mrb[49].mxu1  ;;  %4916 = vmatprep.subr.bf16.mxu0 %v5400_v5 }
 0x6b8   : > { %v2027_v43 = vpop.f32.mrb[50].mxu1 }
 0x6b9   : > { %v4889_v44 = vpop.f32.mrb[51].mxu1  ;;  %4911 = vmatmul.mubr.msk.bf16.vlgmr.msra.gmra.mrb[56].mxu1 %vm1598_vm4, %v2033_v41 }
 0x6ba   : > { %4938 = vmatprep.mubr.msk.bf16.mxu1 %vm5401_vm3, %v5400_v5  ;;  %4923 = vmatpush3.bf16.msra.mxu1 %v5240_v18  ;;  %v5253_v18 = vld [vmem:[%s6532_s7 + $0x60] sm:$0xff]  }
 0x6bb   : > { %4924 = vmatprep.subr.bf16.mxu1 %v5400_v5 }
 0x6be   : > { %4925 = vmatpush3.bf16.msra.mxu1 %v5241_v29  ;;  %v5263_v29 = vld [vmem:[%s6480_s9 + $0x68] sm:$0xff]  }
 0x6bf   : > { %4926 = vmatprep.subr.bf16.mxu1 %v5400_v5 }
 0x6c2   : > { %4927 = vmatpush3.bf16.msra.mxu1 %v5242_v30  ;;  %v5264_v30 = vld [vmem:[%s6532_s7 + $0x50] sm:$0xff]  }
 0x6c3   : > { %4928 = vmatprep.subr.bf16.mxu1 %v5400_v5 }
 0x6c6   : > { %4929 = vmatpush3.bf16.msra.mxu1 %v5243_v31  ;;  %v5265_v31 = vld [vmem:[%s6532_s7 + $0x58] sm:$0xff]  }
 0x6c7   : > { %4930 = vmatprep.subr.bf16.mxu1 %v5400_v5 }
 0x6ca   : > { %4931 = vmatpush3.bf16.msra.mxu1 %v5244_v32  ;;  %v5266_v32 = vld [vmem:[%s6532_s7 + $0x70] sm:$0xff]  }
 0x6cb   : > { %4932 = vmatprep.subr.bf16.mxu1 %v5400_v5 }
 0x6ce   : > { %4933 = vmatpush3.bf16.msra.mxu1 %v5245_v33  ;;  %v5267_v33 = vld [vmem:[%s6532_s7 + $0x78] sm:$0xff]  }
 0x6cf   : > { %4934 = vmatprep.subr.bf16.mxu1 %v5400_v5 }
 0x6d2   : > { %4935 = vmatpush3.bf16.msra.mxu1 %v5246_v34  ;;  %v5268_v34 = vld [vmem:[%s6480_s9 + $0x50] sm:$0xff]  }
 0x6d3   : > { %4936 = vmatprep.subr.bf16.mxu1 %v5400_v5 }
 0x6d6   : > { %4937 = vmatpush3.bf16.msra.mxu1 %v5247_v35  ;;  %v5269_v35 = vld [vmem:[%s6480_s9 + $0x58] sm:$0xff]  }
 0x6d7   : > { %4974 = vmatprep.subr.bf16.mxu1 %v5400_v5 }
 0x77c   : > { %v2078_v45 = vpop.f32.mrb[32].mxu0 }
 0x77d   : > { %v4894_v46 = vpop.f32.mrb[33].mxu0  ;;  %v2222_v52 = vsel %vm801_vm2, %v2078_v45, 0.0 }
 0x77e   : > { %v2081_v47 = vpop.f32.mrb[34].mxu0 }
 0x77f   : > { %v4895_v48 = vpop.f32.mrb[35].mxu0 }
 0x784   : > { %v2124_v49 = vpop.f32.mrb[52].mxu1 }
 0x785   : > { %v2223_v53 = vsel %vm801_vm2, %v2124_v49, 0.0  ;;  %v4900_v54 = vpop.f32.mrb[53].mxu1 }
 0x786   : > { %v2224_v55 = vadd.f32 %v2223_v53, %v2222_v52  ;;  %v2127_v56 = vpop.f32.mrb[54].mxu1  ;;  %v4376_v54 = vld [vmem:[%s6489_s18] ss:$0 sm:$0xff] }
 0x787   : > { %v4901_v58 = vpop.f32.mrb[55].mxu1 }
 0x788   : > { %v2170_v60 = vpop.f32.mrb[36].mxu0 }
 0x789   : > { %v2225_v61 = vsel %vm801_vm2, %v2170_v60, 0.0  ;;  %v4906_v62 = vpop.f32.mrb[37].mxu0 }
 0x78a   : > { %v2226_v0 = vadd.f32 %v2225_v61, %v2224_v55  ;;  %v2173_v1 = vpop.f32.mrb[38].mxu0 }
 0x78b   : > { %v4907_v2 = vpop.f32.mrb[39].mxu0 }
 0x78c   : > { %v2216_v4 = vpop.f32.mrb[56].mxu1 }
 0x78d   : > { %v2227_v7 = vsel %vm801_vm2, %v2216_v4, 0.0  ;;  %v4912_v8 = vpop.f32.mrb[57].mxu1 }
 0x78e   : > { %v2228_v9 = vadd.f32 %v2227_v7, %v2226_v0  ;;  %v2219_v57 = vpop.f32.mrb[58].mxu1 }
 0x78f   : > { %v4913_v10 = vpop.f32.mrb[59].mxu1  ;;  %v5249_v57 = vld [vmem:[%s6532_s7 + $0x40] sm:$0xff]  }
 0x790   : > { %v2229_v12 = vadd.f32 %v2228_v9, %v5676_v59  ;;  %v5239_v59 = vld [vmem:[%s6486_s15 + $0x8] sm:$0xff]   ;;  %v5248_v9 = vld [vmem:[%s6531_s2 + $0x40] sm:$0xff]  }
 0x791   : > { %4917 = vmatpush3.bf16.msra.mxu0 %v5239_v59  ;;  %v5250_v10 = vld [vmem:[%s6531_s2 + $0x48] sm:$0xff]   ;;  %v5252_v59 = vld [vmem:[%s6531_s2 + $0x50] sm:$0xff]  }
 0x792   : > { %v5984_v13 = vadd.f32 %v4369_v11, %v2229_v12  ;;  %4942 = vmatprep.subr.bf16.mxu0 %v5400_v5  ;;  %v5251_v11 = vld [vmem:[%s6532_s7 + $0x48] sm:$0xff]  }
 0x794   : > { %v2240_v14 = vsel %vm801_vm2, %v5984_v13, 0.0 }
 0x795   : > { %2241 = vadd.xlane.f32.xlu0 %v2240_v14 }
 0x822   : > { %v2242_v15 = vpop.xlane.xlu0 %2241 }
 0x823   : > { %v2243_v63 = vmul.f32 0.03125, %v2242_v15 }
 0x825   : > { %v2244_v16 = vsub.f32 %v5984_v13, %v2243_v63  ;;  %v4387_v63 = vld [vmem:[%s6533_s25 + $0x1] ss:$0 sm:$0xff] }
 0x827   : > { %v2245_v50 = vmul.f32 %v2244_v16, %v2244_v16 }
 0x829   : > { %v2246_v17 = vsel %vm801_vm2, %v2245_v50, 0.0  ;;  %v4388_v50 = vld [vmem:[%s6534_s26 + $0x1] ss:$0 sm:$0xff] }
 0x82a   : > { %2247 = vadd.xlane.f32.xlu1 %v2246_v17 }
 0x8b7   : > { %v2248_v19 = vpop.xlane.xlu1 %2247 }
 0x8b8   : > { %v2249_v20 = vmul.f32 0.03125, %v2248_v19 }
 0x8ba   : > { %v2250_v21 = vadd.f32 1e-05, %v2249_v20  ;;  %v5254_v20 = vld [vmem:[%s6531_s2 + $0x58] sm:$0xff]  }
 0x8bc   : > { %5306 = vrsqrt.f32 %v2250_v21  ;;  %v5255_v21 = vld [vmem:[%s6532_s7 + $0x68] sm:$0xff]   ;;  %s6540_s7 = sld [smem:[#allocation21_spill]] }
 0x8c6   : > { %v5307_v22 = vpop.eup %5306 }
 0x8c7   : > { %v2252_v24 = vmul.f32 %v5307_v22, %v2244_v16  ;;  %v5256_v22 = vld [vmem:[%s6531_s2 + $0x60] sm:$0xff]  }
 0x8c9   : > { %v2259_v26 = vmul.f32 %v4370_v23, %v2252_v24  ;;  %v5257_v23 = vld [vmem:[%s6480_s9 + $0x40] sm:$0xff]   ;;  %v5258_v24 = vld [vmem:[%s6531_s2 + $0x68] sm:$0xff]  }
 0x8cb   : > { %v2266_v27 = vadd.f32 %v4371_v25, %v2259_v26  ;;  %v5259_v25 = vld [vmem:[%s6480_s9 + $0x48] sm:$0xff]   ;;  %v5260_v26 = vld [vmem:[%s6531_s2 + $0x70] sm:$0xff]  }
 0x8cd   : > { %v2267_v28 = vpack.c.bf16 %v2266_v27, %v2266_v27  ;;  %v5261_v27 = vld [vmem:[%s6480_s9 + $0x60] sm:$0xff]  }
 0x8cf   : > { %4919 = vmatmul.mubr.msk.bf16.vlgmr.msra.gmra.mrb[40].mxu0 %vm801_vm2, %v2267_v28  ;;  %v5262_v28 = vld [vmem:[%s6531_s2 + $0x78] sm:$0xff]   ;;  %s4566_s2 = sshll.u32 %s5539_s4, 8  ;;  %s5402_s4 = smov [#allocation2]  }
 0x8d0   : > { %4946 = vmatprep.mubr.msk.bf16.mxu0 %vm5401_vm3, %v5400_v5  ;;  %4943 = vmatpush3.bf16.msra.mxu0 %v5248_v9  ;;  %s6431_s3 = scalar_lea.hbm %s6540_s7, %s4566_s2 }
 0x8d1   : > { %4944 = vmatprep.subr.bf16.mxu0 %v5400_v5 }
 0x8d4   : > { %4945 = vmatpush3.bf16.msra.mxu0 %v5250_v10  ;;  %v4481_v10 = vld [vmem:[%s6481_s10 + $0x4] ss:$0 sm:$0xff] }
 0x8d5   : > { %4950 = vmatprep.subr.bf16.mxu0 %v5400_v5 }
 0x9a2   : > { %v2328_v37 = vpop.f32.mrb[40].mxu0 }
 0x9a3   : > { %v2329_v38 = vadd.f32 %v4372_v36, %v2328_v37  ;;  %v4920_v39 = vpop.f32.mrb[41].mxu0  ;;  %v5270_v36 = vld [vmem:[%s6480_s9 + $0x70] sm:$0xff]   ;;  %v5271_v37 = vld [vmem:[%s6480_s9 + $0x78] sm:$0xff]  }
 0x9a4   : > { %v2331_v40 = vpop.f32.mrb[42].mxu0 }
 0x9a5   : > { %v2335_v41 = vmul.f32 0.044715, %v2329_v38  ;;  %v4921_v42 = vpop.f32.mrb[43].mxu0  ;;  %v2334_v48 = vmul.f32 0.5, %v2329_v38 }
 0x9a7   : > { %v2336_v43 = vmul.f32 %v2335_v41, %v2329_v38 }
 0x9a9   : > { %v2337_v44 = vmul.f32 %v2336_v43, %v2329_v38 }
 0x9ab   : > { %v2338_v45 = vadd.f32 %v2337_v44, %v2329_v38  ;;  %v4445_v38 = vld [vmem:[%s6535_s8 + $0x4] ss:$0 sm:$0xff] }
 0x9ad   : > { %v2339_v46 = vmul.f32 0.7978846, %v2338_v45 }
 0x9af   : > { %5308 = vtanh.f32 %v2339_v46 }
 0x9b9   : > { %v5309_v47 = vpop.eup %5308 }
 0x9ba   : > { %v2341_v49 = vadd.f32 1.0, %v5309_v47 }
 0x9bc   : > { %v2342_v52 = vmul.f32 %v2341_v49, %v2334_v48  ;;  %v4409_v49 = vld [vmem:[%s6536_s23 + $0x4] ss:$0 sm:$0xff] }
 0x9be   : > { %v2343_v53 = vpack.c.bf16 %v2342_v52, %v2342_v52 }
 0x9c0   : > { %4939 = vmatmul.mubr.bf16.vlgmr.msra.gmra.mrb[60].mxu1 %v2343_v53  ;;  %v4447_v53 = vld [vmem:[%s6535_s8 + $0x6] ss:$0 sm:$0xff] }
 0x9c1   : > { %4978 = vmatprep.mubr.msk.bf16.mxu1 %vm5401_vm3, %v5400_v5  ;;  %4975 = vmatpush3.bf16.msra.mxu1 %v5249_v57  ;;  %v4411_v57 = vld [vmem:[%s6536_s23 + $0x6] ss:$0 sm:$0xff] }
 0x9c2   : > { %4976 = vmatprep.subr.bf16.mxu1 %v5400_v5 }
 0x9c5   : > { %4977 = vmatpush3.bf16.msra.mxu1 %v5251_v11 }
 0x9c6   : > { %4990 = vmatprep.subr.bf16.mxu1 %v5400_v5 }
 0xa93   : > { %v2449_v55 = vpop.f32.mrb[60].mxu1 }
 0xa94   : > { %v2450_v56 = vadd.f32 %v4376_v54, %v2449_v55  ;;  %v4940_v58 = vpop.f32.mrb[61].mxu1 }
 0xa95   : > { %v2452_v60 = vpop.f32.mrb[62].mxu1 }
 0xa96   : > { %v6048_v61 = vadd.f32 %v2450_v56, %v5984_v13  ;;  %v4941_v62 = vpop.f32.mrb[63].mxu1 }
 0xa98   : > { %v2460_v0 = vsel %vm801_vm2, %v6048_v61, 0.0 }
 0xa99   : > { %2461 = vadd.xlane.f32.xlu0 %v2460_v0 }
 0xb26   : > { %v2462_v1 = vpop.xlane.xlu0 %2461 }
 0xb27   : > { %v2463_v2 = vmul.f32 0.03125, %v2462_v1 }
 0xb29   : > { %v2464_v4 = vsub.f32 %v6048_v61, %v2463_v2 }
 0xb2b   : > { %v2465_v7 = vmul.f32 %v2464_v4, %v2464_v4 }
 0xb2d   : > { %v2466_v8 = vsel %vm801_vm2, %v2465_v7, 0.0 }
 0xb2e   : > { %2467 = vadd.xlane.f32.xlu1 %v2466_v8 }
 0xbbb   : > { %v2468_v12 = vpop.xlane.xlu1 %2467 }
 0xbbc   : > { %v2469_v13 = vmul.f32 0.03125, %v2468_v12 }
 0xbbe   : > { %v2470_v14 = vadd.f32 1e-05, %v2469_v13 }
 0xbc0   : > { %5310 = vrsqrt.f32 %v2470_v14 }
 0xbca   : > { %v5311_v15 = vpop.eup %5310 }
 0xbcb   : > { %v2472_v16 = vmul.f32 %v5311_v15, %v2464_v4 }
 0xbcd   : > { %v2479_v17 = vmul.f32 %v4387_v63, %v2472_v16 }
 0xbcf   : > { %v2486_v51 = vadd.f32 %v4388_v50, %v2479_v17 }
 0xbd1   : > { %v6082_v19 = vpack.c.bf16 %v2486_v51, %v2486_v51 }
 0xbd3   : > { %4947 = vmatmul.mubr.msk.bf16.vlgmr.msra.gmra.mrb[44].mxu0 %vm801_vm2, %v6082_v19  ;;  %4979 = vmatmul.mubr.msk.bf16.vlgmr.msra.gmra.mrb[64].mxu1 %vm801_vm2, %v6082_v19 }
 0xbd4   : > { %4951 = vmatpush3.bf16.msra.mxu0 %v5252_v59  ;;  %4991 = vmatpush3.bf16.msra.mxu1 %v5253_v18 }
 0xbd5   : > { %4952 = vmatprep.subr.bf16.mxu0 %v5400_v5  ;;  %4992 = vmatprep.subr.bf16.mxu1 %v5400_v5 }
 0xbd6   : > { %4954 = vmatprep.mubr.msk.bf16.mxu0 %vm5401_vm3, %v5400_v5  ;;  %4994 = vmatprep.mubr.msk.bf16.mxu1 %vm5401_vm3, %v5400_v5 }
 0xbd8   : > { %4953 = vmatpush3.bf16.msra.mxu0 %v5254_v20  ;;  %4993 = vmatpush3.bf16.msra.mxu1 %v5255_v21 }
 0xbd9   : > { %4958 = vmatprep.subr.bf16.mxu0 %v5400_v5  ;;  %5006 = vmatprep.subr.bf16.mxu1 %v5400_v5 }
 0xbdb   : > { %4955 = vmatmul.mubr.msk.bf16.vlgmr.msra.gmra.mrb[48].mxu0 %vm801_vm2, %v6082_v19  ;;  %4995 = vmatmul.mubr.msk.bf16.vlgmr.msra.gmra.mrb[68].mxu1 %vm801_vm2, %v6082_v19 }
 0xbdc   : > { %4959 = vmatpush3.bf16.msra.mxu0 %v5256_v22  ;;  %5007 = vmatpush3.bf16.msra.mxu1 %v5257_v23 }
 0xbdd   : > { %4960 = vmatprep.subr.bf16.mxu0 %v5400_v5  ;;  %5008 = vmatprep.subr.bf16.mxu1 %v5400_v5 }
 0xbde   : > { %4962 = vmatprep.mubr.msk.bf16.mxu0 %vm5401_vm3, %v5400_v5  ;;  %5010 = vmatprep.mubr.msk.bf16.mxu1 %vm5401_vm3, %v5400_v5 }
 0xbe0   : > { %4961 = vmatpush3.bf16.msra.mxu0 %v5258_v24  ;;  %5009 = vmatpush3.bf16.msra.mxu1 %v5259_v25 }
 0xbe1   : > { %4966 = vmatprep.subr.bf16.mxu0 %v5400_v5  ;;  %5022 = vmatprep.subr.bf16.mxu1 %v5400_v5 }
 0xbe3   : > { %4963 = vmatmul.mubr.msk.bf16.vlgmr.msra.gmra.mrb[52].mxu0 %vm801_vm2, %v6082_v19  ;;  %5011 = vmatmul.mubr.msk.bf16.vlgmr.msra.gmra.mrb[72].mxu1 %vm801_vm2, %v6082_v19 }
 0xbe4   : > { %4967 = vmatpush3.bf16.msra.mxu0 %v5260_v26  ;;  %5023 = vmatpush3.bf16.msra.mxu1 %v5261_v27 }
 0xbe5   : > { %4968 = vmatprep.subr.bf16.mxu0 %v5400_v5  ;;  %5024 = vmatprep.subr.bf16.mxu1 %v5400_v5 }
 0xbe6   : > { %4970 = vmatprep.mubr.msk.bf16.mxu0 %vm5401_vm3, %v5400_v5  ;;  %5026 = vmatprep.mubr.msk.bf16.mxu1 %vm5401_vm3, %v5400_v5 }
 0xbe8   : > { %4969 = vmatpush3.bf16.msra.mxu0 %v5262_v28  ;;  %5025 = vmatpush3.bf16.msra.mxu1 %v5263_v29  ;;  %v4446_v28 = vld [vmem:[%s6535_s8 + $0x5] ss:$0 sm:$0xff] }
 0xbe9   : > { %4982 = vmatprep.subr.bf16.mxu0 %v5400_v5  ;;  %5038 = vmatprep.subr.bf16.mxu1 %v5400_v5 }
 0xbeb   : > { %4971 = vmatmul.mubr.msk.bf16.vlgmr.msra.gmra.mrb[56].mxu0 %vm801_vm2, %v6082_v19  ;;  %5027 = vmatmul.mubr.msk.bf16.vlgmr.msra.gmra.mrb[76].mxu1 %vm801_vm2, %v6082_v19 }
 0xbec   : > { %4983 = vmatpush3.bf16.msra.mxu0 %v5264_v30  ;;  %4986 = vmatprep.mubr.msk.bf16.mxu0 %vm5401_vm3, %v5400_v5 }
 0xbed   : > { %4984 = vmatprep.subr.bf16.mxu0 %v5400_v5  ;;  %5040 = vmatprep.mubr.msk.bf16.mxu1 %vm5401_vm3, %v5400_v5 }
 0xbf0   : > { %4985 = vmatpush3.bf16.msra.mxu0 %v5265_v31 }
 0xbf1   : > { %4998 = vmatprep.subr.bf16.mxu0 %v5400_v5 }
 0xbf3   : > { %4987 = vmatmul.mubr.msk.bf16.vlgmr.msra.gmra.mrb[60].mxu0 %vm801_vm2, %v6082_v19 }
 0xbf4   : > { %4999 = vmatpush3.bf16.msra.mxu0 %v5266_v32  ;;  %5002 = vmatprep.mubr.msk.bf16.mxu0 %vm5401_vm3, %v5400_v5 }
 0xbf5   : > { %5000 = vmatprep.subr.bf16.mxu0 %v5400_v5 }
 0xbf8   : > { %5001 = vmatpush3.bf16.msra.mxu0 %v5267_v33 }
 0xbf9   : > { %5014 = vmatprep.subr.bf16.mxu0 %v5400_v5 }
 0xbfb   : > { %5003 = vmatmul.mubr.msk.bf16.vlgmr.msra.gmra.mrb[64].mxu0 %vm801_vm2, %v6082_v19 }
 0xbfc   : > { %5015 = vmatpush3.bf16.msra.mxu0 %v5268_v34  ;;  %5018 = vmatprep.mubr.msk.bf16.mxu0 %vm5401_vm3, %v5400_v5 }
 0xbfd   : > { %5016 = vmatprep.subr.bf16.mxu0 %v5400_v5 }
 0xc00   : > { %5017 = vmatpush3.bf16.msra.mxu0 %v5269_v35  ;;  %v4410_v35 = vld [vmem:[%s6536_s23 + $0x5] ss:$0 sm:$0xff] }
 0xc01   : > { %5030 = vmatprep.subr.bf16.mxu0 %v5400_v5 }
 0xc03   : > { %5019 = vmatmul.mubr.msk.bf16.vlgmr.msra.gmra.mrb[68].mxu0 %vm801_vm2, %v6082_v19 }
 0xc04   : > { %5031 = vmatpush3.bf16.msra.mxu0 %v5270_v36  ;;  %5034 = vmatprep.mubr.msk.bf16.mxu0 %vm5401_vm3, %v5400_v5 }
 0xc05   : > { %5032 = vmatprep.subr.bf16.mxu0 %v5400_v5 }
 0xc08   : > { %5033 = vmatpush3.bf16.msra.mxu0 %v5271_v37  ;;  %v4448_v37 = vld [vmem:[%s6535_s8 + $0x7] ss:$0 sm:$0xff]  ;;  %s5338_s8 = sshll.u32 %s5402_s4, 4  ;;  %s5339_s8 = int_to_ptr.vmem [resolvable:$false] %s5338_s8 }
 0xc09   : > { %5044 = vmatprep.subr.bf16.mxu0 %v5400_v5  ;;  %s5340_s6 = scalar_lea.vmem %s5339_s8, 512  ;;  %p5341_p0 = scmp.lt.s32.totalorder %s6426_s5, %s5339_s8 }
 0xc0a   : > { %p5342_p1 = scmp.lt.s32.totalorder %s5340_s6, %s5334_s1 }
 0xc0b   : > { %5035 = vmatmul.mubr.msk.bf16.vlgmr.msra.gmra.mrb[72].mxu0 %vm801_vm2, %v6082_v19 }
 0xc0c   : > { %5046 = vmatprep.mubr.msk.bf16.mxu0 %vm5401_vm3, %v5400_v5  ;;  %p5343_p2 = por %p5342_p1, %p5341_p0 }
 0xc0e   : > { %p5344_p3 = pnand %p5343_p2, %p5337_p13 }
 0xca6   : > { %v2583_v39 = vpop.f32.mrb[44].mxu0  ;;  %v2837_v40 = vpop.f32.mrb[64].mxu1 }
 0xca7   : > { %v2838_v41 = vadd.f32 %v4445_v38, %v2837_v40  ;;  %v4948_v42 = vpop.f32.mrb[45].mxu0  ;;  %v4980_v43 = vpop.f32.mrb[65].mxu1  ;;  %v2584_v54 = vadd.f32 %v4409_v49, %v2583_v39 }
 0xca8   : > { %v2586_v44 = vpop.f32.mrb[46].mxu0  ;;  %v2840_v45 = vpop.f32.mrb[66].mxu1 }
 0xca9   : > { %v3257_v46 = vpack.c.bf16 %v2838_v41, %v2838_v41  ;;  %v4949_v47 = vpop.f32.mrb[47].mxu0  ;;  %v4981_v48 = vpop.f32.mrb[67].mxu1  ;;  %v3253_v2 = vpack.c.bf16 %v2584_v54, %v2584_v54 }
 0xcaa   : > { %v4482_v48 = vld [vmem:[%s6481_s10 + $0x5] ss:$0 sm:$0xff] }
 0xcab   : > { %v3265_v52 = vsel %vm1598_vm4, %v3257_v46, 0  ;;  %v4412_v46 = vld [vmem:[%s6536_s23 + $0x7] ss:$0 sm:$0xff] }
 0xcac   : > { %5039 = vmatpush3.bf16.xpose.msra.mxu1 %v3265_v52 }
 0xcad   : > { %5050 = vmatprep.subr.bf16.mxu1 %v5400_v5 }
 0xcae   : > { %v2635_v55 = vpop.f32.mrb[48].mxu0  ;;  %v2941_v56 = vpop.f32.mrb[68].mxu1 }
 0xcaf   : > { %v2942_v58 = vadd.f32 %v4447_v53, %v2941_v56  ;;  %v4956_v60 = vpop.f32.mrb[49].mxu0  ;;  %v4996_v62 = vpop.f32.mrb[69].mxu1  ;;  %v2636_v38 = vadd.f32 %v4410_v35, %v2635_v55 }
 0xcb0   : > { %v2638_v0 = vpop.f32.mrb[50].mxu0  ;;  %v2944_v1 = vpop.f32.mrb[70].mxu1 }
 0xcb1   : > { %v3259_v4 = vpack.c.bf16 %v2942_v58, %v2942_v58  ;;  %v4957_v7 = vpop.f32.mrb[51].mxu0  ;;  %v4997_v8 = vpop.f32.mrb[71].mxu1  ;;  %v3254_v43 = vpack.c.bf16 %v2636_v38, %v2636_v38 }
 0xcb3   : > { %v3357_v9 = vsel %vm1598_vm4, %v3259_v4, 0  ;;  %5041 = vmatmul.mubr.msk.bf16.vlgmr.msra.gmra.mrb[80].mxu1 %vm1598_vm4, %v3253_v2 }
 0xcb4   : > { %5051 = vmatpush3.bf16.xpose.msra.mxu1 %v3357_v9  ;;  %5052 = vmatprep.mubr.msk.bf16.mxu1 %vm5401_vm3, %v5400_v5 }
 0xcb5   : > { %5062 = vmatprep.subr.bf16.mxu1 %v5400_v5 }
 0xcb6   : > { %v2687_v11 = vpop.f32.mrb[52].mxu0  ;;  %v3091_v12 = vpop.f32.mrb[72].mxu1 }
 0xcb7   : > { %v2688_v13 = vadd.f32 %v4411_v57, %v2687_v11  ;;  %v3092_v14 = vadd.f32 %v4481_v10, %v3091_v12  ;;  %v4964_v15 = vpop.f32.mrb[53].mxu0  ;;  %v5012_v63 = vpop.f32.mrb[73].mxu1 }
 0xcb8   : > { %v2690_v16 = vpop.f32.mrb[54].mxu0  ;;  %v3094_v50 = vpop.f32.mrb[74].mxu1 }
 0xcb9   : > { %v3255_v17 = vpack.c.bf16 %v2688_v13, %v2688_v13  ;;  %v3501_v51 = vpack.c.bf16 %v3092_v14, %v3092_v14  ;;  %v4965_v59 = vpop.f32.mrb[55].mxu0  ;;  %v5013_v18 = vpop.f32.mrb[75].mxu1 }
 0xcbb   : > { %v3509_v19 = vsel %vm1848_vm5, %v3501_v51, 0  ;;  %5053 = vmatmul.mubr.msk.bf16.vlgmr.msra.gmra.mrb[84].mxu1 %vm1598_vm4, %v3255_v17 }
 0xcbc   : > { %5063 = vmatpush3.bf16.msra.mxu1 %v3509_v19  ;;  %5064 = vmatprep.mubr.msk.bf16.mxu1 %vm5401_vm3, %v5400_v5 }
 0xcbd   : > { %5074 = vmatprep.subr.bf16.mxu1 %v5400_v5 }
 0xcbe   : > { %v2739_v20 = vpop.f32.mrb[56].mxu0  ;;  %v6233_v21 = vpop.f32.mrb[76].mxu1 }
 0xcbf   : > { %v4972_v22 = vpop.f32.mrb[57].mxu0  ;;  %v5028_v23 = vpop.f32.mrb[77].mxu1  ;;  %v2740_v49 = vadd.f32 %v4412_v46, %v2739_v20 }
 0xcc0   : > { %v2742_v24 = vpop.f32.mrb[58].mxu0  ;;  %v3198_v25 = vpop.f32.mrb[78].mxu1 }
 0xcc1   : > { %v4973_v26 = vpop.f32.mrb[59].mxu0  ;;  %v5029_v27 = vpop.f32.mrb[79].mxu1  ;;  %v3256_v56 = vpack.c.bf16 %v2740_v49, %v2740_v49 }
 0xcc6   : > { %v2889_v29 = vpop.f32.mrb[60].mxu0 }
 0xcc7   : > { %v2890_v30 = vadd.f32 %v4446_v28, %v2889_v29  ;;  %v4988_v31 = vpop.f32.mrb[61].mxu0 }
 0xcc8   : > { %v2892_v32 = vpop.f32.mrb[62].mxu0 }
 0xcc9   : > { %v3258_v33 = vpack.c.bf16 %v2890_v30, %v2890_v30  ;;  %v4989_v34 = vpop.f32.mrb[63].mxu0 }
 0xccb   : > { %v3311_v36 = vsel %vm1598_vm4, %v3258_v33, 0 }
 0xccc   : > { %5045 = vmatpush3.bf16.xpose.msra.mxu0 %v3311_v36 }
 0xccd   : > { %5056 = vmatprep.subr.bf16.mxu0 %v5400_v5 }
 0xcce   : > { %v2993_v39 = vpop.f32.mrb[64].mxu0 }
 0xccf   : > { %v2994_v40 = vadd.f32 %v4448_v37, %v2993_v39  ;;  %v5004_v41 = vpop.f32.mrb[65].mxu0 }
 0xcd0   : > { %v2996_v42 = vpop.f32.mrb[66].mxu0 }
 0xcd1   : > { %v3260_v44 = vpack.c.bf16 %v2994_v40, %v2994_v40  ;;  %v5005_v45 = vpop.f32.mrb[67].mxu0 }
 0xcd3   : > { %v3403_v47 = vsel %vm1598_vm4, %v3260_v44, 0  ;;  %5047 = vmatmul.mubr.msk.bf16.vlgmr.msra.gmra.mrb[76].mxu0 %vm1598_vm4, %v3254_v43 }
 0xcd4   : > { %5057 = vmatpush3.bf16.xpose.msra.mxu0 %v3403_v47  ;;  %5058 = vmatprep.mubr.msk.bf16.mxu0 %vm5401_vm3, %v5400_v5 }
 0xcd5   : > { %5068 = vmatprep.subr.bf16.mxu0 %v5400_v5 }
 0xcd6   : > { %v3143_v52 = vpop.f32.mrb[68].mxu0 }
 0xcd7   : > { %v3144_v53 = vadd.f32 %v4482_v48, %v3143_v52  ;;  %v5020_v54 = vpop.f32.mrb[69].mxu0 }
 0xcd8   : > { %v3146_v55 = vpop.f32.mrb[70].mxu0 }
 0xcd9   : > { %v3502_v58 = vpack.c.bf16 %v3144_v53, %v3144_v53  ;;  %v5021_v60 = vpop.f32.mrb[71].mxu0  ;;  %v4483_v53 = vld [vmem:[%s6481_s10 + $0x6] ss:$0 sm:$0xff] }
 0xcda   : > { %v3196_v54 = vadd.f32 %v4483_v53, %v6233_v21 }
 0xcdb   : > { %v3555_v62 = vsel %vm1848_vm5, %v3502_v58, 0  ;;  %5059 = vmatmul.mubr.msk.bf16.vlgmr.msra.gmra.mrb[80].mxu0 %vm1598_vm4, %v3256_v56 }
 0xcdc   : > { %5069 = vmatpush3.bf16.msra.mxu0 %v3555_v62  ;;  %5070 = vmatprep.mubr.msk.bf16.mxu0 %vm5401_vm3, %v5400_v5  ;;  %v3503_v58 = vpack.c.bf16 %v3196_v54, %v3196_v54 }
 0xcdd   : > { %5080 = vmatprep.subr.bf16.mxu0 %v5400_v5 }
 0xcde   : > { %v6262_v0 = vpop.f32.mrb[72].mxu0 }
 0xcdf   : > { %v5036_v1 = vpop.f32.mrb[73].mxu0 }
 0xce0   : > { %v3250_v2 = vpop.f32.mrb[74].mxu0  ;;  %v3601_v1 = vsel %vm1848_vm5, %v3503_v58, 0 }
 0xce1   : > { %v5037_v4 = vpop.f32.mrb[75].mxu0 }
 0xd86   : > { %v3301_v7 = vpop.f32.mrb[80].mxu1 }
 0xd87   : > { %v3445_v8 = vmul.f32 0.35355338, %v3301_v7  ;;  %v5042_v9 = vpop.f32.mrb[81].mxu1 }
 0xd88   : > { %v3304_v57 = vpop.f32.mrb[82].mxu1 }
 0xd89   : > { %v5043_v10 = vpop.f32.mrb[83].mxu1  ;;  %v3449_v11 = vsel %vm5900_vm6, %v3445_v8, -1e+30  ;;  %v4484_v8 = vld [vmem:[%s6481_s10 + $0x7] ss:$0 sm:$0xff] }
 0xd8a   : > { %v3453_v12 = vsel %vm1598_vm4, %v3449_v11, -inf  ;;  %v3248_v9 = vadd.f32 %v4484_v8, %v6262_v0  ;;  %v4505_v0 = vld [vmem:[%s6482_s11 + $0x10] sm:$0xf] }
 0xd8b   : > { %3454 = vmax.xlane.f32.xlu0 %v3453_v12 }
 0xd8e   : > { %v3393_v13 = vpop.f32.mrb[84].mxu1 }
 0xd8f   : > { %v3447_v14 = vmul.f32 0.35355338, %v3393_v13  ;;  %v5054_v15 = vpop.f32.mrb[85].mxu1 }
 0xd90   : > { %v3396_v63 = vpop.f32.mrb[86].mxu1 }
 0xd91   : > { %v5055_v16 = vpop.f32.mrb[87].mxu1  ;;  %v3451_v50 = vsel %vm5900_vm6, %v3447_v14, -1e+30 }
 0xd92   : > { %v3459_v17 = vsel %vm1598_vm4, %v3451_v50, -inf }
 0xd93   : > { %3460 = vmax.xlane.f32.xlu0 %v3459_v17  ;;  %v4506_v17 = vld [vmem:[%s6482_s11 + $0x14] sm:$0xf] }
 0xda6   : > { %v3347_v51 = vpop.f32.mrb[76].mxu0 }
 0xda7   : > { %v3446_v59 = vmul.f32 0.35355338, %v3347_v51  ;;  %v5048_v18 = vpop.f32.mrb[77].mxu0  ;;  %v3748_v51 = vsel %vm1848_vm5, %v4506_v17, 0 }
 0xda8   : > { %v3350_v19 = vpop.f32.mrb[78].mxu0 }
 0xda9   : > { %v5049_v20 = vpop.f32.mrb[79].mxu0  ;;  %v3450_v22 = vsel %vm5900_vm6, %v3446_v59, -1e+30  ;;  %v4507_v59 = vld [vmem:[%s6482_s11 + $0x18] sm:$0xf] }
 0xdaa   : > { %v3456_v23 = vsel %vm1598_vm4, %v3450_v22, -inf }
 0xdab   : > { %3457 = vmax.xlane.f32.xlu1 %v3456_v23 }
 0xdae   : > { %v3439_v24 = vpop.f32.mrb[80].mxu0 }
 0xdaf   : > { %v3448_v25 = vmul.f32 0.35355338, %v3439_v24  ;;  %v5060_v26 = vpop.f32.mrb[81].mxu0 }
 0xdb0   : > { %v3442_v27 = vpop.f32.mrb[82].mxu0 }
 0xdb1   : > { %v5061_v28 = vpop.f32.mrb[83].mxu0  ;;  %v3452_v29 = vsel %vm5900_vm6, %v3448_v25, -1e+30 }
 0xdb2   : > { %v3462_v30 = vsel %vm1598_vm4, %v3452_v29, -inf }
 0xdb3   : > { %3463 = vmax.xlane.f32.xlu1 %v3462_v30  ;;  %v4508_v30 = vld [vmem:[%s6482_s11 + $0x1c] sm:$0xf] }
 0xe18   : > { %v3455_v31 = vpop.xlane.xlu0 %3454 }
 0xe19   : > { %v3465_v32 = vsub.f32 %v3449_v11, %v3455_v31  ;;  %v3504_v11 = vpack.c.bf16 %v3248_v9, %v3248_v9  ;;  %v4514_v9 = vld [vmem:[%s6483_s12 + $0x1] ss:$0 sm:$0xff] }
 0xe1b   : > { %v3469_v33 = vmul.f32 1.442695, %v3465_v32  ;;  %v3647_v14 = vsel %vm1848_vm5, %v3504_v11, 0 }
 0xe1d   : > { %5312 = vpow2.f32 %v3469_v33 }
 0xe20   : > { %v3461_v34 = vpop.xlane.xlu0 %3460 }
 0xe21   : > { %v3467_v35 = vsub.f32 %v3451_v50, %v3461_v34  ;;  %v3702_v50 = vsel %vm1848_vm5, %v4505_v0, 0  ;;  %v3840_v34 = vsel %vm1848_vm5, %v4508_v30, 0  ;;  %v5274_v0 = vld [vmem:[%s6488_s17 + $0x40] sm:$0xff]   ;;  %v5281_v30 = vld [vmem:[%s6488_s17 + $0x78] sm:$0xff]  }
 0xe23   : > { %v3473_v36 = vmul.f32 1.442695, %v3467_v35 }
 0xe25   : > { %5314 = vpow2.f32 %v3473_v36 }
 0xe27   : > { %v5313_v37 = vpop.eup %5312 }
 0xe28   : > { %v3477_v38 = vsel %vm1598_vm4, %v5313_v37, 0.0 }
 0xe29   : > { %3478 = vadd.xlane.f32.xlu0 %v3477_v38 }
 0xe2f   : > { %v5315_v39 = vpop.eup %5314 }
 0xe30   : > { %v3483_v40 = vsel %vm1598_vm4, %v5315_v39, 0.0 }
 0xe31   : > { %3484 = vadd.xlane.f32.xlu0 %v3483_v40 }
 0xe38   : > { %v3458_v6 = vpop.xlane.xlu1 %3457 }
 0xe39   : > { %v3466_v41 = vsub.f32 %v3450_v22, %v3458_v6  ;;  %v3794_v22 = vsel %vm1848_vm5, %v4507_v59, 0 }
 0xe3b   : > { %v3471_v42 = vmul.f32 1.442695, %v3466_v41 }
 0xe3d   : > { %5316 = vpow2.f32 %v3471_v42 }
 0xe40   : > { %v3464_v43 = vpop.xlane.xlu1 %3463 }
 0xe41   : > { %v3468_v44 = vsub.f32 %v3452_v29, %v3464_v43 }
 0xe43   : > { %v3475_v45 = vmul.f32 1.442695, %v3468_v44 }
 0xe45   : > { %5318 = vpow2.f32 %v3475_v45 }
 0xe47   : > { %v5317_v46 = vpop.eup %5316 }
 0xe48   : > { %v3480_v47 = vsel %vm1598_vm4, %v5317_v46, 0.0 }
 0xe49   : > { %3481 = vadd.xlane.f32.xlu1 %v3480_v47 }
 0xe4f   : > { %v5319_v48 = vpop.eup %5318 }
 0xe50   : > { %v3486_v49 = vsel %vm1598_vm4, %v5319_v48, 0.0 }
 0xe51   : > { %3487 = vadd.xlane.f32.xlu1 %v3486_v49 }
 0xeb6   : > { %v3479_v52 = vpop.xlane.xlu0 %3478 }
 0xeb7   : > { %5320 = vrcp.f32 %v3479_v52 }
 0xebe   : > { %v3485_v55 = vpop.xlane.xlu0 %3484 }
 0xebf   : > { %5322 = vrcp.f32 %v3485_v55 }
 0xec1   : > { %v5321_v56 = vpop.eup %5320 }
 0xec2   : > { %v3493_v60 = vmul.f32 %v5321_v56, %v5313_v37 }
 0xec4   : > { %v3497_v62 = vpack.c.bf16 %v3493_v60, %v3493_v60 }
 0xec6   : > { %5065 = vmatmul.mubr.msk.bf16.vlgmr.msra.gmra.mrb[88].mxu1 %vm1598_vm4, %v3497_v62 }
 0xec7   : > { %5075 = vmatpush3.bf16.msra.mxu1 %v3601_v1  ;;  %5076 = vmatprep.mubr.msk.bf16.mxu1 %vm5401_vm3, %v5400_v5 }
 0xec8   : > { %5086 = vmatprep.subr.bf16.mxu1 %v5400_v5 }
 0xec9   : > { %v5323_v2 = vpop.eup %5322 }
 0xeca   : > { %v3495_v4 = vmul.f32 %v5323_v2, %v5315_v39 }
 0xecc   : > { %v3499_v7 = vpack.c.bf16 %v3495_v4, %v3495_v4 }
 0xece   : > { %5077 = vmatmul.mubr.msk.bf16.vlgmr.msra.gmra.mrb[92].mxu1 %vm1598_vm4, %v3499_v7 }
 0xecf   : > { %5088 = vmatprep.mubr.msk.bf16.mxu1 %vm5401_vm3, %v5400_v5  ;;  %5087 = vmatpush3.bf16.msra.mxu1 %v3702_v50 }
 0xed0   : > { %5098 = vmatprep.subr.bf16.mxu1 %v5400_v5 }
 0xed6   : > { %v3482_v21 = vpop.xlane.xlu1 %3481 }
 0xed7   : > { %5324 = vrcp.f32 %v3482_v21 }
 0xede   : > { %v3488_v57 = vpop.xlane.xlu1 %3487 }
 0xedf   : > { %5326 = vrcp.f32 %v3488_v57 }
 0xee1   : > { %v5325_v10 = vpop.eup %5324 }
 0xee2   : > { %v3494_v12 = vmul.f32 %v5325_v10, %v5317_v46 }
 0xee4   : > { %v3498_v13 = vpack.c.bf16 %v3494_v12, %v3494_v12 }
 0xee6   : > { %5071 = vmatmul.mubr.msk.bf16.vlgmr.msra.gmra.mrb[84].mxu0 %vm1598_vm4, %v3498_v13 }
 0xee7   : > { %5081 = vmatpush3.bf16.msra.mxu0 %v3647_v14  ;;  %5082 = vmatprep.mubr.msk.bf16.mxu0 %vm5401_vm3, %v5400_v5 }
 0xee8   : > { %5092 = vmatprep.subr.bf16.mxu0 %v5400_v5 }
 0xee9   : > { %v5327_v15 = vpop.eup %5326 }
 0xeea   : > { %v3496_v63 = vmul.f32 %v5327_v15, %v5319_v48 }
 0xeec   : > { %v3500_v16 = vpack.c.bf16 %v3496_v63, %v3496_v63 }
 0xeee   : > { %5083 = vmatmul.mubr.msk.bf16.vlgmr.msra.gmra.mrb[88].mxu0 %vm1598_vm4, %v3500_v16  ;;  %v5272_v16 = vld [vmem:[%s6486_s15 + $0x10] sm:$0xff]  }
 0xeef   : > { %5094 = vmatprep.mubr.msk.bf16.mxu0 %vm5401_vm3, %v5400_v5  ;;  %5093 = vmatpush3.bf16.msra.mxu0 %v3748_v51 }
 0xef0   : > { %5104 = vmatprep.subr.bf16.mxu0 %v5400_v5 }
 0xf99   : > { %v3545_v18 = vpop.f32.mrb[88].mxu1 }
 0xf9a   : > { %v3689_v19 = vpack.c.bf16 %v3545_v18, %v3545_v18  ;;  %v5066_v20 = vpop.f32.mrb[89].mxu1  ;;  %v4517_v18 = vld [vmem:[%s6484_s13 + $0x1] ss:$0 sm:$0xff] }
 0xf9b   : > { %v3548_v23 = vpop.f32.mrb[90].mxu1  ;;  %v4518_v20 = vld [vmem:[%s6485_s14 + $0x1] ss:$0 sm:$0xff] }
 0xf9c   : > { %v5067_v24 = vpop.f32.mrb[91].mxu1  ;;  %5089 = vmatmul.mubr.msk.bf16.vlgmr.msra.gmra.mrb[96].mxu1 %vm1598_vm4, %v3689_v19 }
 0xf9d   : > { %5099 = vmatpush3.bf16.msra.mxu1 %v3794_v22  ;;  %5100 = vmatprep.mubr.msk.bf16.mxu1 %vm5401_vm3, %v5400_v5 }
 0xf9e   : > { %5110 = vmatprep.subr.bf16.mxu1 %v5400_v5 }
 0xfa1   : > { %v3637_v25 = vpop.f32.mrb[92].mxu1 }
 0xfa2   : > { %v3691_v26 = vpack.c.bf16 %v3637_v25, %v3637_v25  ;;  %v5078_v27 = vpop.f32.mrb[93].mxu1  ;;  %v5275_v25 = vld [vmem:[%s6488_s17 + $0x48] sm:$0xff]  }
 0xfa3   : > { %v3640_v28 = vpop.f32.mrb[94].mxu1  ;;  %v5277_v27 = vld [vmem:[%s6488_s17 + $0x58] sm:$0xff]  }
 0xfa4   : > { %v5079_v29 = vpop.f32.mrb[95].mxu1  ;;  %5101 = vmatmul.mubr.msk.bf16.vlgmr.msra.gmra.mrb[100].mxu1 %vm1598_vm4, %v3691_v26  ;;  %v5276_v26 = vld [vmem:[%s6488_s17 + $0x50] sm:$0xff]   ;;  %v5279_v28 = vld [vmem:[%s6488_s17 + $0x68] sm:$0xff]  }
 0xfa5   : > { %5114 = vmatprep.mubr.msk.bf16.mxu1 %vm5401_vm3, %v5400_v5  ;;  %5111 = vmatpush3.bf16.msra.mxu1 %v5272_v16  ;;  %v5280_v29 = vld [vmem:[%s6488_s17 + $0x70] sm:$0xff]  }
 0xfa6   : > { %5112 = vmatprep.subr.bf16.mxu1 %v5400_v5 }
 0xfb9   : > { %v3591_v31 = vpop.f32.mrb[84].mxu0 }
 0xfba   : > { %v3690_v32 = vpack.c.bf16 %v3591_v31, %v3591_v31  ;;  %v5072_v33 = vpop.f32.mrb[85].mxu0  ;;  %v4524_v31 = vld [vmem:[%s6487_s16 + $0x1] ss:$0 sm:$0xff] }
 0xfbb   : > { %v3594_v35 = vpop.f32.mrb[86].mxu0 }
 0xfbc   : > { %v5073_v36 = vpop.f32.mrb[87].mxu0  ;;  %5095 = vmatmul.mubr.msk.bf16.vlgmr.msra.gmra.mrb[92].mxu0 %vm1598_vm4, %v3690_v32 }
 0xfbd   : > { %5105 = vmatpush3.bf16.msra.mxu0 %v3840_v34  ;;  %5106 = vmatprep.mubr.msk.bf16.mxu0 %vm5401_vm3, %v5400_v5 }
 0xfbe   : > { %5118 = vmatprep.subr.bf16.mxu0 %v5400_v5 }
 0xfc1   : > { %v3683_v37 = vpop.f32.mrb[88].mxu0 }
 0xfc2   : > { %v3692_v38 = vpack.c.bf16 %v3683_v37, %v3683_v37  ;;  %v5084_v39 = vpop.f32.mrb[89].mxu0 }
 0xfc3   : > { %v3686_v40 = vpop.f32.mrb[90].mxu0 }
 0xfc4   : > { %v5085_v6 = vpop.f32.mrb[91].mxu0  ;;  %5107 = vmatmul.mubr.msk.bf16.vlgmr.msra.gmra.mrb[96].mxu0 %vm1598_vm4, %v3692_v38 }
 0xfc5   : > { %5134 = vmatprep.mubr.msk.bf16.mxu0 %vm5401_vm3, %v5400_v5  ;;  %5119 = vmatpush3.bf16.msra.mxu0 %v5274_v0 }
 0xfc6   : > { %5120 = vmatprep.subr.bf16.mxu0 %v5400_v5 }
 0xfc9   : > { %5121 = vmatpush3.bf16.msra.mxu0 %v5275_v25 }
 0xfca   : > { %5122 = vmatprep.subr.bf16.mxu0 %v5400_v5 }
 0xfcd   : > { %5123 = vmatpush3.bf16.msra.mxu0 %v5276_v26 }
 0xfce   : > { %5124 = vmatprep.subr.bf16.mxu0 %v5400_v5 }
 0xfd1   : > { %5125 = vmatpush3.bf16.msra.mxu0 %v5277_v27 }
 0xfd2   : > { %5126 = vmatprep.subr.bf16.mxu0 %v5400_v5 }
0x106f   : > { %v3738_v41 = vpop.f32.mrb[96].mxu1 }
0x1070   : > { %v5090_v42 = vpop.f32.mrb[97].mxu1  ;;  %v3882_v52 = vsel %vm801_vm2, %v3738_v41, 0.0 }
0x1071   : > { %v3741_v43 = vpop.f32.mrb[98].mxu1 }
0x1072   : > { %v5091_v44 = vpop.f32.mrb[99].mxu1 }
0x1077   : > { %v3830_v45 = vpop.f32.mrb[100].mxu1 }
0x1078   : > { %v5102_v46 = vpop.f32.mrb[101].mxu1  ;;  %v3885_v58 = vsel %vm801_vm2, %v3830_v45, 0.0  ;;  %v4545_v45 = vld [vmem:[%s6489_s18 + $0x1] ss:$0 sm:$0xff] }
0x1079   : > { %v3833_v47 = vpop.f32.mrb[102].mxu1 }
0x107a   : > { %v5103_v48 = vpop.f32.mrb[103].mxu1 }
0x108f   : > { %v3784_v49 = vpop.f32.mrb[92].mxu0 }
0x1090   : > { %v3883_v53 = vsel %vm801_vm2, %v3784_v49, 0.0  ;;  %v5096_v54 = vpop.f32.mrb[93].mxu0 }
0x1091   : > { %v3884_v55 = vadd.f32 %v3883_v53, %v3882_v52  ;;  %v3787_v56 = vpop.f32.mrb[94].mxu0 }
0x1092   : > { %v5097_v60 = vpop.f32.mrb[95].mxu0 }
0x1093   : > { %v3886_v62 = vadd.f32 %v3885_v58, %v3884_v55 }
0x1097   : > { %v3876_v1 = vpop.f32.mrb[96].mxu0 }
0x1098   : > { %v3887_v2 = vsel %vm801_vm2, %v3876_v1, 0.0  ;;  %v5108_v4 = vpop.f32.mrb[97].mxu0  ;;  %v5284_v1 = vld [vmem:[%s6492_s21 + $0x4] ss:$8 sps:$4 sm:$0xff]  }
0x1099   : > { %v3888_v7 = vadd.f32 %v3887_v2, %v3886_v62  ;;  %v3879_v21 = vpop.f32.mrb[98].mxu0  ;;  %v5282_v2 = vld [vmem:[%s6492_s21] ss:$8 sps:$4 sm:$0xff]   ;;  %v5285_v4 = vld [vmem:[%s6492_s21 + $0x10] ss:$8 sps:$4 sm:$0xff]  }
0x109a   : > { %v5109_v8 = vpop.f32.mrb[99].mxu0 }
0x109b   : > { %v3889_v57 = vadd.f32 %v3888_v7, %v6048_v61  ;;  %v5273_v61 = vld [vmem:[%s6486_s15 + $0x18] sm:$0xff]  }
0x109c   : > { %5113 = vmatpush3.bf16.msra.mxu1 %v5273_v61  ;;  %v5287_v7 = vld [vmem:[%s6492_s21 + $0x14] ss:$8 sps:$4 sm:$0xff]  }
0x109d   : > { %v6344_v10 = vadd.f32 %v4514_v9, %v3889_v57  ;;  %4180 = vmatprep.subr.bf16.mxu1 %v5284_v1 }
0x109f   : > { %v3903_v11 = vsel %vm801_vm2, %v6344_v10, 0.0 }
0x10a0   : > { %3904 = vadd.xlane.f32.xlu0 %v3903_v11 }
0x112d   : > { %v3905_v12 = vpop.xlane.xlu0 %3904 }
0x112e   : > { %v3906_v13 = vmul.f32 0.03125, %v3905_v12  ;;  %v4555_v12 = vld [vmem:[%s6491_s20] ss:$0 sm:$0xff] }
0x1130   : > { %v3907_v14 = vsub.f32 %v6344_v10, %v3906_v13 }
0x1132   : > { %v3908_v15 = vmul.f32 %v3907_v14, %v3907_v14 }
0x1134   : > { %v3909_v63 = vsel %vm801_vm2, %v3908_v15, 0.0 }
0x1135   : > { %3910 = vadd.xlane.f32.xlu1 %v3909_v63 }
0x11c2   : > { %v3911_v50 = vpop.xlane.xlu1 %3910 }
0x11c3   : > { %v3912_v17 = vmul.f32 0.03125, %v3911_v50 }
0x11c5   : > { %v3913_v51 = vadd.f32 1e-05, %v3912_v17 }
0x11c7   : > { %5328 = vrsqrt.f32 %v3913_v51 }
0x11d1   : > { %v5329_v59 = vpop.eup %5328 }
0x11d2   : > { %v3915_v19 = vmul.f32 %v5329_v59, %v3907_v14 }
0x11d4   : > { %v3922_v22 = vmul.f32 %v4517_v18, %v3915_v19 }
0x11d6   : > { %v3929_v23 = vadd.f32 %v4518_v20, %v3922_v22 }
0x11d8   : > { %v3930_v24 = vpack.c.bf16 %v3929_v23, %v3929_v23 }
0x11da   : > { %5115 = vmatmul.mubr.msk.bf16.vlgmr.msra.gmra.mrb[104].mxu1 %vm801_vm2, %v3930_v24 }
0x11db   : > { %4212 = vmatprep.mubr.bf16.mxu1 %v5398_v3  ;;  %v5278_v3 = vld [vmem:[%s6488_s17 + $0x60] sm:$0xff]   ;;  %4181 = vmatpush1.bf16.msra.mxu1 %v5282_v2 }
0x11dc   : > { %5127 = vmatpush3.bf16.msra.mxu0 %v5278_v3  ;;  %4182 = vmatprep.subr.bf16.mxu1 %v5287_v7 }
0x11dd   : > { %5128 = vmatprep.subr.bf16.mxu0 %v5400_v5 }
0x11df   : > { %4183 = vmatpush1.bf16.msra.mxu1 %v5285_v4 }
0x11e0   : > { %5129 = vmatpush3.bf16.msra.mxu0 %v5279_v28 }
0x11e1   : > { %5130 = vmatprep.subr.bf16.mxu0 %v5400_v5 }
0x11e4   : > { %5131 = vmatpush3.bf16.msra.mxu0 %v5280_v29 }
0x11e5   : > { %5132 = vmatprep.subr.bf16.mxu0 %v5400_v5 }
0x11e8   : > { %5133 = vmatpush3.bf16.msra.mxu0 %v5281_v30 }
0x12ad   : > { %v3993_v32 = vpop.f32.mrb[104].mxu1 }
0x12ae   : > { %v3994_v33 = vadd.f32 %v4524_v31, %v3993_v32  ;;  %v5116_v34 = vpop.f32.mrb[105].mxu1 }
0x12af   : > { %v3996_v35 = vpop.f32.mrb[106].mxu1 }
0x12b0   : > { %v4000_v36 = vmul.f32 0.044715, %v3994_v33  ;;  %v5117_v37 = vpop.f32.mrb[107].mxu1  ;;  %v3999_v42 = vmul.f32 0.5, %v3994_v33 }
0x12b2   : > { %v4001_v38 = vmul.f32 %v4000_v36, %v3994_v33 }
0x12b4   : > { %v4002_v39 = vmul.f32 %v4001_v38, %v3994_v33 }
0x12b6   : > { %v4003_v40 = vadd.f32 %v4002_v39, %v3994_v33 }
0x12b8   : > { %v4004_v6 = vmul.f32 0.7978846, %v4003_v40 }
0x12ba   : > { %5330 = vtanh.f32 %v4004_v6 }
0x12c4   : > { %v5331_v41 = vpop.eup %5330 }
0x12c5   : > { %v4006_v43 = vadd.f32 1.0, %v5331_v41 }
0x12c7   : > { %v4007_v5 = vmul.f32 %v4006_v43, %v3999_v42 }
0x12c9   : > { %v4008_v44 = vpack.c.bf16 %v4007_v5, %v4007_v5 }
0x12cb   : > { %5135 = vmatmul.mubr.bf16.vlgmr.msra.gmra.mrb[100].mxu0 %v4008_v44 }
0x139e   : > { %v4116_v46 = vpop.f32.mrb[100].mxu0 }
0x139f   : > { %v4117_v47 = vadd.f32 %v4545_v45, %v4116_v46  ;;  %v5136_v48 = vpop.f32.mrb[101].mxu0 }
0x13a0   : > { %v4119_v49 = vpop.f32.mrb[102].mxu0 }
0x13a1   : > { %v5137_v52 = vpop.f32.mrb[103].mxu0  ;;  %v4122_v53 = vadd.f32 %v4117_v47, %v6344_v10  ;;  %v4554_v10 = vld [vmem:[%s6490_s19] ss:$0 sm:$0xff] }
0x13a3   : > { %v4125_v54 = vsel %vm801_vm2, %v4122_v53, 0.0 }
0x13a4   : > { %4126 = vadd.xlane.f32.xlu0 %v4125_v54 }
0x1431   : > { %v4127_v55 = vpop.xlane.xlu0 %4126 }
0x1432   : > { %v4128_v56 = vmul.f32 0.03125, %v4127_v55 }
0x1434   : > { %v4129_v58 = vsub.f32 %v4122_v53, %v4128_v56 }
0x1436   : > { %v4130_v60 = vmul.f32 %v4129_v58, %v4129_v58 }
0x1438   : > { %v4131_v62 = vsel %vm801_vm2, %v4130_v60, 0.0 }
0x1439   : > { %4132 = vadd.xlane.f32.xlu1 %v4131_v62 }
0x14c6   : > { %v4133_v21 = vpop.xlane.xlu1 %4132 }
0x14c7   : > { %v4134_v8 = vmul.f32 0.03125, %v4133_v21 }
0x14c9   : > { %v4135_v9 = vadd.f32 1e-05, %v4134_v8 }
0x14cb   : > { %5332 = vrsqrt.f32 %v4135_v9 }
0x14d5   : > { %v5333_v57 = vpop.eup %5332 }
0x14d6   : > { %v4137_v11 = vmul.f32 %v5333_v57, %v4129_v58 }
0x14d8   : > { %v4144_v13 = vmul.f32 %v4554_v10, %v4137_v11 }
0x14da   : > { %v4151_v14 = vadd.f32 %v4555_v12, %v4144_v13 }
0x14dc   : > { %v4152_v15 = vpack.c.bf16 %v4151_v14, %v4151_v14 }
0x14de   : > { %4560 = vmatmul.mubr.msk.bf16.vlgmr.msra.gmra.mrb[108].mxu1 %vm801_vm2, %v4152_v15 }
0x15b1   : > { %v4214_v63 = vpop.f32.mrb[108].mxu1 }
0x15b2   : > { %4221 = vst [vmem:[%s674_s30] sm:$0xff] %v4214_v63  ;;  %v4216_v16 = vpop.f32.mrb[109].mxu1 }
0x15b3   : > { %4222 = vst [vmem:[%s674_s30 + $0x8] sm:$0xff] %v4216_v16  ;;  %v4218_v61 = vpop.f32.mrb[110].mxu1 }
0x15b4   : > { %v4219_v0 = vpop.f32.mrb[111].mxu1 }
0x15b5   : > { %5347 = shalt.err (!%p5344_p3)
}
0x15b6   : > { %s5348_s2 = scalar_lea.hbm %s6431_s3, 256  ;;  %s5352_s29 = scalar_lea.hbm %s6540_s7, 512 }
0x15b7   : > { %p5349_p4 = scmp.ne.s32.totalorder %s6431_s3, %s5348_s2  ;;  %p5353_p9 = scmp.lt.u32.totalorder %s6431_s3, %s6540_s7 }
0x15b8   : > { %p5354_p10 = scmp.lt.u32.totalorder %s5352_s29, %s5348_s2  ;;  %p5356_p12 = scmp.lt.u32.totalorder %s5348_s2, %s6431_s3 }
0x15b9   : > { %p5350_p7 = pnand %p5349_p4, %p5556_p5 }
0x15ba   : > { %p5355_p11 = por %p5354_p10, %p5353_p9 }
0x15bb   : > { %p5351_p8 = pneg %p5350_p7 }
0x15bc   : > { %p5357_p13 = por %p5356_p12, %p5355_p11 }
0x15be   : > { %p5358_p0 = pnand %p5357_p13, %p5351_p8 }
0x15c0   : > { %5361 = shalt.err (!%p5358_p0)
}
0x15c1   : > { %5170 = dma.vmem_to_hbm [thread:$0]  (%p5556_p5), %s6426_s5, 256, %s6431_s3, %s4224_s0  }
0x15c2 PF: > { %s6541_s1 = sld [smem:[#allocation7_spill]]  ;;  %s6542_s6 = sld [smem:[#allocation5_spill]] }
0x15c8   : > { %p5176_p1 = scmp.ge.s32.totalorder %s6541_s1, 2  ;;  %s4250_s30 = sand.u32 1, %s6542_s6  }
0x15c9   : > { %s4251_s4 = scalar_lea.sflag [#allocation3], %s4250_s30 }
0x15ca   : > { %p5173_p2 = pnand %p5176_p1, %p5560_p6 }
0x15cc   : > { %5379 = dma.done.wait (!%p5173_p2), %s4251_s4, 256  }
0x15cd   : > { %5381 = vsyncadd (!%p5173_p2), %s4251_s4, 4294967040  ;;  %s6544_s30 = sld [smem:[#allocation8_spill]]  ;;  %s6545_s2 = sld [smem:[#allocation6_spill]] }
0x15ce   : > { %s6546_s29 = sld [smem:[#allocation9_spill]]  ;;  %s6547_s3 = smov %s5388_s28 }
0x15d3   : > { %p32_p3 = scmp.ge.s32.totalorder %s6544_s30, 4   ;;  %s6548_s28 = smov %s6545_s2 }
0x15d5   :  { %34 = sbr.rel (!%p32_p3) target bundleno = 14 (0xe), region = 159 }
0x15dc   :  { %4256 = vsyncpa [#allocation3], 1 }
0x15dd   :  { %4258 = vsyncpa [#allocation3 + $0x1], 1 }

</bundles_post_ra>
